<compile_context>
chip_gen: v7x
topology: tpu7x:2x2x1
jax: 0.10.0
libtpu: 0.0.40
codegen_flags: <defaults>
</compile_context>

<pallas_src>
import functools

import jax
import jax.numpy as jnp
from jax.experimental import pallas as pl
from jax.experimental.pallas import tpu as pltpu


def _graph_constructor_kernel(idx_ref, emb_ref, w_ref, b_ref, r_ref,
                              adj_ref, *, alpha, k):
    n_pad = adj_ref.shape[0]
    nnodes = emb_ref.shape[0]

    idx = idx_ref[...]                                    # (n_pad, 1) int32, -1 padded
    validf = (idx >= 0).astype(jnp.float32)               # (n_pad, 1) row-valid mask

    # Fused embedding gather: one-hot (n_pad, nnodes) @ [emb1|emb2] (nnodes, 2d) on MXU.
    node_iota = jax.lax.broadcasted_iota(jnp.int32, (n_pad, nnodes), 1)
    onehot = (node_iota == idx).astype(jnp.float32)
    e = jnp.dot(onehot, emb_ref[...], preferred_element_type=jnp.float32)   # (n_pad, 2d)

    # Fused linears: [e1|e2] @ blockdiag(W1, W2) + [b1|b2]; tanh; zero padded rows.
    nv = jnp.tanh(alpha * (jnp.dot(e, w_ref[...],
                                   preferred_element_type=jnp.float32)
                           + b_ref[...]))
    nv = nv * validf                                      # P = [nv1 | nv2]

    # Q = P @ R = [nv2 | -nv1]  (R = [[0,-I],[I,0]]; exact, one tiny MXU pass)
    q = jnp.dot(nv, r_ref[...], preferred_element_type=jnp.float32)

    # a = P @ Q.T = nv1@nv2.T - nv2@nv1.T   (single (n_pad, n_pad) MXU matmul)
    a = jax.lax.dot_general(nv, q, (((1,), (1,)), ((), ())),
                            preferred_element_type=jnp.float32)

    adj = jnp.maximum(jnp.tanh(alpha * a), 0.0)           # relu(tanh(alpha*a)) >= 0

    # Per-row top-k threshold: remove exactly one occurrence of the row max
    # (k-1) times; the remaining row max is the k-th largest value.  Padded
    # columns are exactly zero and cannot perturb the threshold.
    col = jax.lax.broadcasted_iota(jnp.int32, adj.shape, 1)

    def body(_, work):
        rowmax = jnp.max(work, axis=1, keepdims=True)
        first = jnp.min(jnp.where(work == rowmax, col, n_pad),
                        axis=1, keepdims=True)
        return jnp.where(col == first, jnp.float32(-1.0), work)

    work = jax.lax.fori_loop(0, k - 1, body, adj, unroll=True)
    thresh = jnp.max(work, axis=1, keepdims=True)

    # keep entries >= k-th largest per row, zero the rest
    adj_ref[...] = jnp.where(adj >= thresh, adj, jnp.float32(0.0))


def graph_constructor_forward(idx, emb1, emb2, w1, b1, w2, b2, *, k, alpha=3.0):
    """idx: (n,) int32 node ids.  Returns sparse-masked adjacency (n, n) f32."""
    n = int(idx.shape[0])
    nnodes, dim = emb1.shape
    assert 1 <= k <= n, "k must be in [1, n]"

    f32 = jnp.float32
    emb1, emb2 = emb1.astype(f32), emb2.astype(f32)
    w1, w2 = w1.astype(f32), w2.astype(f32)
    b1, b2 = b1.astype(f32), b2.astype(f32)

    # Host-side (constant-foldable) packing: one gather operand, one linear
    # weight, one bias, and the swap/negate matrix R used to build Q in-kernel.
    emb_cat = jnp.concatenate([emb1, emb2], axis=1)                    # (nnodes, 2d)
    zeros = jnp.zeros((dim, dim), f32)
    eye = jnp.eye(dim, dtype=f32)
    w_cat = jnp.block([[w1, zeros], [zeros, w2]])                      # (2d, 2d)
    b_cat = jnp.concatenate([b1, b2], axis=1)                          # (1, 2d)
    r_swap = jnp.block([[zeros, -eye], [eye, zeros]])                  # (2d, 2d)

    # Pad node count to a lane-dense multiple of 128 for the adj / top-k phase.
    n_pad = max(128, ((n + 127) // 128) * 128)
    idx_pad = jnp.pad(idx.astype(jnp.int32), (0, n_pad - n),
                      constant_values=-1).reshape(n_pad, 1)

    kernel = functools.partial(_graph_constructor_kernel,
                               alpha=float(alpha), k=int(k))
    vmem = pl.BlockSpec(memory_space=pltpu.MemorySpace.VMEM)

    adj_pad = pl.pallas_call(
        kernel,
        out_shape=jax.ShapeDtypeStruct((n_pad, n_pad), jnp.float32),
        in_specs=[vmem] * 5,
        out_specs=vmem,
    )(idx_pad, emb_cat, w_cat, b_cat, r_swap)

    return adj_pad[:n, :n]


def _reference(idx, emb1, emb2, w1, b1, w2, b2, *, k, alpha=3.0):
    hp = jax.lax.Precision.HIGHEST
    e1 = emb1[idx]
    e2 = emb2[idx]
    nv1 = jnp.tanh(alpha * (jnp.dot(e1, w1, precision=hp) + b1))
    nv2 = jnp.tanh(alpha * (jnp.dot(e2, w2, precision=hp) + b2))
    a = (jnp.dot(nv1, nv2.T, precision=hp) - jnp.dot(nv2, nv1.T, precision=hp))
    adj = jax.nn.relu(jnp.tanh(alpha * a))
    s1, _ = jax.lax.top_k(adj, k)
    thresh = s1[:, -1:]
    return jnp.where(adj >= thresh, adj, 0.0)


if __name__ == "__main__":
    # Small shapes consistent with the module: nnodes nodes, embedding dim, top-k.
    nnodes, dim, k, alpha = 16, 32, 4, 3.0
    prior_mu, prior_sigma = 0.0, 0.1

    key = jax.random.PRNGKey(0)
    k_e1, k_e2, k_w1m, k_w1e, k_b1, k_w2m, k_w2e, k_b2 = jax.random.split(key, 8)

    # nn.Embedding weights ~ N(0, 1)
    emb1 = jax.random.normal(k_e1, (nnodes, dim), jnp.float32)
    emb2 = jax.random.normal(k_e2, (nnodes, dim), jnp.float32)

    # BayesLinear deterministic weight sample: W = mu + sigma * eps  (stored (in, out) = torch W.T)
    w1 = (prior_mu + 0.1 * jax.random.normal(k_w1m, (dim, dim), jnp.float32)
          + prior_sigma * jax.random.normal(k_w1e, (dim, dim), jnp.float32))
    b1 = 0.1 * jax.random.normal(k_b1, (1, dim), jnp.float32)
    w2 = (prior_mu + 0.1 * jax.random.normal(k_w2m, (dim, dim), jnp.float32)
          + prior_sigma * jax.random.normal(k_w2e, (dim, dim), jnp.float32))
    b2 = 0.1 * jax.random.normal(k_b2, (1, dim), jnp.float32)

    idx = jnp.arange(nnodes, dtype=jnp.int32)

    adj = graph_constructor_forward(idx, emb1, emb2, w1, b1, w2, b2,
                                    k=k, alpha=alpha)
    jax.block_until_ready(adj)

    ref = _reference(idx, emb1, emb2, w1, b1, w2, b2, k=k, alpha=alpha)
    assert adj.shape == (nnodes, nnodes)
    assert jnp.allclose(adj, ref, atol=1e-4), float(jnp.max(jnp.abs(adj - ref)))

    print("KERNEL_OK")
</pallas_src>

<mosaic_0001>
module attributes {stable_mosaic.version = 11 : i64} {
  func.func @_graph_constructor_kernel(%arg0: memref<128x1xi32, #tpu.memory_space<vmem>>, %arg1: memref<16x64xf32, #tpu.memory_space<vmem>>, %arg2: memref<64x64xf32, #tpu.memory_space<vmem>>, %arg3: memref<1x64xf32, #tpu.memory_space<vmem>>, %arg4: memref<64x64xf32, #tpu.memory_space<vmem>>, %arg5: memref<128x128xf32, #tpu.memory_space<vmem>>) attributes {dimension_semantics = [], scalar_prefetch = 0 : i64, scratch_operands = 0 : i64, tpu.core_type = #tpu.core_type<tc>} {
    %c0 = arith.constant 0 : index
    %c0_0 = arith.constant 0 : index
    %0 = vector.load %arg0[%c0, %c0_0] : memref<128x1xi32, #tpu.memory_space<vmem>>, vector<128x1xi32>
    %c0_i32 = arith.constant 0 : i32
    %1 = vector.broadcast %c0_i32 : i32 to vector<128x1xi32>
    %2 = arith.cmpi sge, %0, %1 : vector<128x1xi32>
    %3 = arith.extui %2 : vector<128x1xi1> to vector<128x1xi32>
    %4 = arith.sitofp %3 : vector<128x1xi32> to vector<128x1xf32>
    %5 = tpu.iota {dimensions = array<i32: 1>} : vector<128x16xi32>
    %6 = vector.broadcast %0 : vector<128x1xi32> to vector<128x16xi32>
    %7 = arith.cmpi eq, %5, %6 : vector<128x16xi32>
    %8 = arith.extui %7 : vector<128x16xi1> to vector<128x16xi32>
    %9 = arith.sitofp %8 : vector<128x16xi32> to vector<128x16xf32>
    %c0_1 = arith.constant 0 : index
    %c0_2 = arith.constant 0 : index
    %10 = vector.load %arg1[%c0_1, %c0_2] : memref<16x64xf32, #tpu.memory_space<vmem>>, vector<16x64xf32>
    %cst = arith.constant dense<0.000000e+00> : vector<128x64xf32>
    %11 = tpu.matmul %9, %10, %cst {dimension_numbers = #tpu.dot_dimension_numbers<[1], [0], [0], [1], [0, 0, 1, 1], [], []>} : vector<128x16xf32>, vector<16x64xf32>, vector<128x64xf32> -> vector<128x64xf32>
    %c0_3 = arith.constant 0 : index
    %c0_4 = arith.constant 0 : index
    %12 = vector.load %arg2[%c0_3, %c0_4] : memref<64x64xf32, #tpu.memory_space<vmem>>, vector<64x64xf32>
    %cst_5 = arith.constant dense<0.000000e+00> : vector<128x64xf32>
    %13 = tpu.matmul %11, %12, %cst_5 {dimension_numbers = #tpu.dot_dimension_numbers<[1], [0], [0], [1], [0, 0, 1, 1], [], []>} : vector<128x64xf32>, vector<64x64xf32>, vector<128x64xf32> -> vector<128x64xf32>
    %c0_6 = arith.constant 0 : index
    %c0_7 = arith.constant 0 : index
    %14 = vector.load %arg3[%c0_6, %c0_7] : memref<1x64xf32, #tpu.memory_space<vmem>>, vector<1x64xf32>
    %15 = vector.broadcast %14 : vector<1x64xf32> to vector<128x64xf32>
    %16 = arith.addf %13, %15 : vector<128x64xf32>
    %cst_8 = arith.constant 3.000000e+00 : f32
    %17 = vector.broadcast %cst_8 : f32 to vector<128x64xf32>
    %18 = arith.mulf %17, %16 : vector<128x64xf32>
    %19 = math.tanh %18 : vector<128x64xf32>
    %20 = vector.broadcast %4 : vector<128x1xf32> to vector<128x64xf32>
    %21 = arith.mulf %19, %20 : vector<128x64xf32>
    %c0_9 = arith.constant 0 : index
    %c0_10 = arith.constant 0 : index
    %22 = vector.load %arg4[%c0_9, %c0_10] : memref<64x64xf32, #tpu.memory_space<vmem>>, vector<64x64xf32>
    %cst_11 = arith.constant dense<0.000000e+00> : vector<128x64xf32>
    %23 = tpu.matmul %21, %22, %cst_11 {dimension_numbers = #tpu.dot_dimension_numbers<[1], [0], [0], [1], [0, 0, 1, 1], [], []>} : vector<128x64xf32>, vector<64x64xf32>, vector<128x64xf32> -> vector<128x64xf32>
    %cst_12 = arith.constant dense<0.000000e+00> : vector<128x128xf32>
    %24 = tpu.matmul %21, %23, %cst_12 {dimension_numbers = #tpu.dot_dimension_numbers<[1], [1], [0], [0], [0, 0, 1, 0], [], []>} : vector<128x64xf32>, vector<128x64xf32>, vector<128x128xf32> -> vector<128x128xf32>
    %cst_13 = arith.constant 3.000000e+00 : f32
    %25 = vector.broadcast %cst_13 : f32 to vector<128x128xf32>
    %26 = arith.mulf %25, %24 : vector<128x128xf32>
    %27 = math.tanh %26 : vector<128x128xf32>
    %cst_14 = arith.constant 0.000000e+00 : f32
    %28 = vector.broadcast %cst_14 : f32 to vector<128x128xf32>
    %29 = arith.maximumf %27, %28 : vector<128x128xf32>
    %30 = tpu.iota {dimensions = array<i32: 1>} : vector<128x128xi32>
    %c0_i32_15 = arith.constant 0 : i32
    %cst_16 = arith.constant dense<0xFF800000> : vector<128xf32>
    %31 = vector.multi_reduction <maximumf>, %29, %cst_16 [1] : vector<128x128xf32> to vector<128xf32>
    %32 = vector.shape_cast %31 : vector<128xf32> to vector<128x1xf32>
    %33 = vector.broadcast %32 : vector<128x1xf32> to vector<128x128xf32>
    %34 = arith.cmpf oeq, %29, %33 : vector<128x128xf32>
    %c128_i32 = arith.constant 128 : i32
    %35 = vector.broadcast %c128_i32 : i32 to vector<128x128xi32>
    %36 = arith.select %34, %30, %35 : vector<128x128xi1>, vector<128x128xi32>
    %cst_17 = arith.constant dense<2147483647> : vector<128xi32>
    %37 = vector.multi_reduction <minsi>, %36, %cst_17 [1] : vector<128x128xi32> to vector<128xi32>
    %38 = vector.shape_cast %37 : vector<128xi32> to vector<128x1xi32>
    %39 = vector.broadcast %38 : vector<128x1xi32> to vector<128x128xi32>
    %40 = arith.cmpi eq, %30, %39 : vector<128x128xi32>
    %cst_18 = arith.constant -1.000000e+00 : f32
    %41 = vector.broadcast %cst_18 : f32 to vector<128x128xf32>
    %42 = arith.select %40, %41, %29 : vector<128x128xi1>, vector<128x128xf32>
    %c1_i32 = arith.constant 1 : i32
    %cst_19 = arith.constant dense<0xFF800000> : vector<128xf32>
    %43 = vector.multi_reduction <maximumf>, %42, %cst_19 [1] : vector<128x128xf32> to vector<128xf32>
    %44 = vector.shape_cast %43 : vector<128xf32> to vector<128x1xf32>
    %45 = vector.broadcast %44 : vector<128x1xf32> to vector<128x128xf32>
    %46 = arith.cmpf oeq, %42, %45 : vector<128x128xf32>
    %c128_i32_20 = arith.constant 128 : i32
    %47 = vector.broadcast %c128_i32_20 : i32 to vector<128x128xi32>
    %48 = arith.select %46, %30, %47 : vector<128x128xi1>, vector<128x128xi32>
    %cst_21 = arith.constant dense<2147483647> : vector<128xi32>
    %49 = vector.multi_reduction <minsi>, %48, %cst_21 [1] : vector<128x128xi32> to vector<128xi32>
    %50 = vector.shape_cast %49 : vector<128xi32> to vector<128x1xi32>
    %51 = vector.broadcast %50 : vector<128x1xi32> to vector<128x128xi32>
    %52 = arith.cmpi eq, %30, %51 : vector<128x128xi32>
    %cst_22 = arith.constant -1.000000e+00 : f32
    %53 = vector.broadcast %cst_22 : f32 to vector<128x128xf32>
    %54 = arith.select %52, %53, %42 : vector<128x128xi1>, vector<128x128xf32>
    %c2_i32 = arith.constant 2 : i32
    %cst_23 = arith.constant dense<0xFF800000> : vector<128xf32>
    %55 = vector.multi_reduction <maximumf>, %54, %cst_23 [1] : vector<128x128xf32> to vector<128xf32>
    %56 = vector.shape_cast %55 : vector<128xf32> to vector<128x1xf32>
    %57 = vector.broadcast %56 : vector<128x1xf32> to vector<128x128xf32>
    %58 = arith.cmpf oeq, %54, %57 : vector<128x128xf32>
    %c128_i32_24 = arith.constant 128 : i32
    %59 = vector.broadcast %c128_i32_24 : i32 to vector<128x128xi32>
    %60 = arith.select %58, %30, %59 : vector<128x128xi1>, vector<128x128xi32>
    %cst_25 = arith.constant dense<2147483647> : vector<128xi32>
    %61 = vector.multi_reduction <minsi>, %60, %cst_25 [1] : vector<128x128xi32> to vector<128xi32>
    %62 = vector.shape_cast %61 : vector<128xi32> to vector<128x1xi32>
    %63 = vector.broadcast %62 : vector<128x1xi32> to vector<128x128xi32>
    %64 = arith.cmpi eq, %30, %63 : vector<128x128xi32>
    %cst_26 = arith.constant -1.000000e+00 : f32
    %65 = vector.broadcast %cst_26 : f32 to vector<128x128xf32>
    %66 = arith.select %64, %65, %54 : vector<128x128xi1>, vector<128x128xf32>
    %cst_27 = arith.constant dense<0xFF800000> : vector<128xf32>
    %67 = vector.multi_reduction <maximumf>, %66, %cst_27 [1] : vector<128x128xf32> to vector<128xf32>
    %68 = vector.shape_cast %67 : vector<128xf32> to vector<128x1xf32>
    %69 = vector.broadcast %68 : vector<128x1xf32> to vector<128x128xf32>
    %70 = arith.cmpf oge, %29, %69 : vector<128x128xf32>
    %cst_28 = arith.constant 0.000000e+00 : f32
    %71 = vector.broadcast %cst_28 : f32 to vector<128x128xf32>
    %72 = arith.select %70, %29, %71 : vector<128x128xi1>, vector<128x128xf32>
    %c0_29 = arith.constant 0 : index
    %c0_30 = arith.constant 0 : index
    %73 = vector.load %arg5[%c0_29, %c0_30] : memref<128x128xf32, #tpu.memory_space<vmem>>, vector<128x128xf32>
    tpu.vector_store %arg5[%c0_29, %c0_30], %72 {strides = array<i32>} : memref<128x128xf32, #tpu.memory_space<vmem>>, vector<128x128xf32>,
    return
  }
}

</mosaic_0001>

<bundles_post_ra>
// kernel: tpu_custom_call.1
= control target key start
LH: loop header
LB: loop body
LE: loop exit
PB: predicated region body
PF: predicated region fallthrough
CT: control target
= control target key end

     0   :  { %10 = vsyncpa [#allocation3], 0  ;;  %s4179_s0 = inlined_call_operand.vmem [shape: s32[128,1], index: 0, kind: input, shape index: {}]   ;;  %s4180_s1 = inlined_call_operand.hbm [shape: f32[16,64], index: 1, kind: input, shape index: {}]   ;;  %s4181_s2 = inlined_call_operand.vmem [shape: f32[64,64], index: 2, kind: input, shape index: {}]   ;;  %s4182_s3 = inlined_call_operand.vmem [shape: f32[1,64], index: 3, kind: input, shape index: {}]   ;;  %s4183_s4 = inlined_call_operand.vmem [shape: f32[64,64], index: 4, kind: input, shape index: {}]   ;;  %s4184_s5 = inlined_call_operand.hbm [shape: f32[128,128], index: 5, kind: output, shape index: {}]  }
   0x1   :  { %11 = vsyncpa [#allocation4], 0  ;;  %s2848_s18 = smov [#allocation2]   ;;  %s2800_s22 = scalar_lea.hbm %s4180_s1, 256 }
   0x2   :  { %s19_s19 = sshll.u32 %s2848_s18, 4  ;;  %p2801_p0 = scmp.ne.s32.totalorder %s4180_s1, %s2800_s22  ;;  %s20_s19 = int_to_ptr.vmem [resolvable:$true] %s19_s19 }
   0x3   :  { %p2804_p1 = scmp.lt.u32.totalorder %s2800_s22, %s4180_s1 }
   0x5   :  { %p2806_p2 = pnand %p2804_p1, %p2801_p0 }
   0x7   :  { %2809 = shalt.err (!%p2806_p2)
}
   0x8   :  { %s2810_s27 = scalar_lea.vmem %s20_s19, 256  ;;  %p2815_p4 = scmp.lt.s32.totalorder %s20_s19, %s20_s19 }
   0x9   :  { %p2811_p3 = scmp.ne.s32.totalorder %s20_s19, %s2810_s27  ;;  %p2816_p5 = scmp.lt.s32.totalorder %s2810_s27, %s2810_s27 }
   0xb   :  { %p2817_p6 = por %p2816_p5, %p2815_p4 }
   0xd   :  { %p2818_p7 = pnand %p2817_p6, %p2811_p3 }
   0xf   :  { %2821 = shalt.err (!%p2818_p7)
}
  0x10   :  { %s2849_s28 = smov 128   ;;  %s2850_s29 = smov 8  }
  0x11   :  { %25 = dma.hbm_to_vmem [thread:$0]  %s4180_s1, 256, %s20_s19, [#allocation3], %s2849_s28, %s2849_s28, %s2850_s29  }
  0x12   :  { %2844 = dma.done.wait [#allocation3], 256  }
  0x13   :  { %2845 = vsyncadd [#allocation3], 4294967040  ;;  %v2851_v0 = vmov 0   ;;  %v37_v1 = vld [vmem:[%s4179_s0 + $0x10] sm:$0xff]  ;;  %v35_v2 = vld [vmem:[%s4179_s0] sm:$0xff]  ;;  %v2852_v18 = vmov 0.0   ;;  %v99_v48 = vlaneseq }
  0x14   :  { %2695 = vset.pattern.permute.xlu1 %v2851_v0  ;;  %2694 = vset.pattern.permute.xlu0 %v2851_v0  ;;  %v38_v3 = vld [vmem:[%s4179_s0 + $0x18] sm:$0xff]  ;;  %v36_v4 = vld [vmem:[%s4179_s0 + $0x8] sm:$0xff]  ;;  %v39_v6 = vld [vmem:[%s4179_s0 + $0x20] sm:$0xff]  ;;  %vm53_vm0 = vcmp.ge.s32.totalorder %v37_v1, 0  ;;  %vm51_vm1 = vcmp.ge.s32.totalorder %v35_v2, 0 }
  0x15   :  { %108 = vperm.xlu1 %2695, %v37_v1   ;;  %102 = vperm.xlu0 %2694, %v35_v2   ;;  %v40_v5 = vld [vmem:[%s4179_s0 + $0x28] sm:$0xff]  ;;  %v197_v7 = vld [vmem:[#allocation2] sm:$0xff]  ;;  %v42_v9 = vld [vmem:[%s4179_s0 + $0x38] sm:$0xff]  ;;  %vm54_vm2 = vcmp.ge.s32.totalorder %v38_v3, 0  ;;  %vm52_vm3 = vcmp.ge.s32.totalorder %v36_v4, 0  ;;  %v2231_v19 = vsel %vm53_vm0, 1.0, %v2852_v18 }
  0x16   :  { %v198_v8 = vld [vmem:[#allocation2 + $0x8] sm:$0xff]  ;;  %v41_v10 = vld [vmem:[%s4179_s0 + $0x30] sm:$0xff]  ;;  %v43_v13 = vld [vmem:[%s4179_s0 + $0x40] sm:$0xff]  ;;  %v2229_v20 = vsel %vm51_vm1, 1.0, %v2852_v18  ;;  %v2232_v21 = vsel %vm54_vm2, 1.0, %v2852_v18  ;;  %v2230_v22 = vsel %vm52_vm3, 1.0, %v2852_v18 }
  0x17   :  { %v2604_v11 = vpack.c.bf16 %v198_v8, %v197_v7  ;;  %v44_v12 = vld [vmem:[%s4179_s0 + $0x48] sm:$0xff]  ;;  %v46_v14 = vld [vmem:[%s4179_s0 + $0x58] sm:$0xff]  ;;  %v45_v15 = vld [vmem:[%s4179_s0 + $0x50] sm:$0xff]  ;;  %vm56_vm4 = vcmp.ge.s32.totalorder %v40_v5, 0  ;;  %vm55_vm5 = vcmp.ge.s32.totalorder %v39_v6, 0  ;;  %vm58_vm6 = vcmp.ge.s32.totalorder %v42_v9, 0 }
  0x18   :  { %v48_v16 = vld [vmem:[%s4179_s0 + $0x68] sm:$0xff]  ;;  %v47_v17 = vld [vmem:[%s4179_s0 + $0x60] sm:$0xff]  ;;  %v50_v23 = vld [vmem:[%s4179_s0 + $0x78] sm:$0xff]  ;;  %vm57_vm7 = vcmp.ge.s32.totalorder %v41_v10, 0  ;;  %v2701_v25 = vpack.i.bf16 %v2232_v21, %v2231_v19  ;;  %v2696_v26 = vpack.i.bf16 %v2230_v22, %v2229_v20  ;;  %v2234_v27 = vsel %vm56_vm4, 1.0, %v2852_v18 }
  0x19   :  { %111 = vperm.xlu1 %2695, %v38_v3   ;;  %105 = vperm.xlu0 %2694, %v36_v4   ;;  %v49_v24 = vld [vmem:[%s4179_s0 + $0x70] sm:$0xff]  ;;  %v2233_v28 = vsel %vm55_vm5, 1.0, %v2852_v18  ;;  %v2236_v29 = vsel %vm58_vm6, 1.0, %v2852_v18  ;;  %v2235_v30 = vsel %vm57_vm7, 1.0, %v2852_v18  ;;  %vm60_vm8 = vcmp.ge.s32.totalorder %v44_v12, 0  ;;  %v393_v45 = vld [vmem:[%s4181_s2] sm:$0xff] }
  0x1a   :  { %2605 = vmatprep.subr.bf16.mxu0 %v2604_v11  ;;  %vm59_vm9 = vcmp.ge.s32.totalorder %v43_v13, 0  ;;  %vm62_vm10 = vcmp.ge.s32.totalorder %v46_v14, 0  ;;  %vm61_vm11 = vcmp.ge.s32.totalorder %v45_v15, 0  ;;  %v2711_v31 = vpack.i.bf16 %v2236_v29, %v2235_v30  ;;  %v394_v46 = vld [vmem:[%s4181_s2 + $0x8] sm:$0xff]  ;;  %v395_v53 = vld [vmem:[%s4181_s2 + $0x10] sm:$0xff]  ;;  %v396_v54 = vld [vmem:[%s4181_s2 + $0x18] sm:$0xff] }
  0x1b   :  { %2607 = vmatpush3.bf16.msra.mxu0 %v2604_v11  ;;  %v2706_v32 = vpack.i.bf16 %v2234_v27, %v2233_v28  ;;  %v2238_v33 = vsel %vm60_vm8, 1.0, %v2852_v18  ;;  %v2237_v34 = vsel %vm59_vm9, 1.0, %v2852_v18  ;;  %v2240_v35 = vsel %vm62_vm10, 1.0, %v2852_v18  ;;  %v397_v60 = vld [vmem:[%s4181_s2 + $0x20] sm:$0xff]  ;;  %v398_v61 = vld [vmem:[%s4181_s2 + $0x28] sm:$0xff]  ;;  %v399_v3 = vld [vmem:[%s4181_s2 + $0x30] sm:$0xff] }
  0x1c   :  { %v2239_v36 = vsel %vm61_vm11, 1.0, %v2852_v18  ;;  %vm64_vm12 = vcmp.ge.s32.totalorder %v48_v16, 0  ;;  %vm63_vm13 = vcmp.ge.s32.totalorder %v47_v17, 0  ;;  %vm66_vm14 = vcmp.ge.s32.totalorder %v50_v23, 0  ;;  %v400_v4 = vld [vmem:[%s4181_s2 + $0x38] sm:$0xff]  ;;  %v730_v28 = vld [vmem:[%s4183_s4] sm:$0xff] }
  0x1d   :  { %117 = vperm.xlu1 %2695, %v40_v5   ;;  %114 = vperm.xlu0 %2694, %v39_v6   ;;  %vm65_vm15 = vcmp.ge.s32.totalorder %v49_v24, 0  ;;  %v2721_v37 = vpack.i.bf16 %v2240_v35, %v2239_v36  ;;  %v2716_v38 = vpack.i.bf16 %v2238_v33, %v2237_v34  ;;  %v2242_v39 = vsel %vm64_vm12, 1.0, %v2852_v18  ;;  %v731_v29 = vld [vmem:[%s4183_s4 + $0x8] sm:$0xff] }
  0x1e   :  { %v2241_v40 = vsel %vm63_vm13, 1.0, %v2852_v18  ;;  %v2244_v41 = vsel %vm66_vm14, 1.0, %v2852_v18  ;;  %v2243_v42 = vsel %vm65_vm15, 1.0, %v2852_v18  ;;  %v2608_v47 = vpack.c.bf16 %v394_v46, %v393_v45 }
  0x1f   :  { %v2731_v43 = vpack.i.bf16 %v2244_v41, %v2243_v42  ;;  %v2726_v44 = vpack.i.bf16 %v2242_v39, %v2241_v40  ;;  %v2969_v49 = vand.u32 127, %v99_v48  ;;  %vm199_vm0 = vcmask 130048  }
  0x20   :  { %2609 = vmatprep.subr.bf16.mxu0 %v2608_v47  ;;  %v2612_v58 = vpack.c.bf16 %v396_v54, %v395_v53  ;;  %v2616_v1 = vpack.c.bf16 %v398_v61, %v397_v60  ;;  %v2620_v7 = vpack.c.bf16 %v400_v4, %v399_v3  ;;  %v2624_v30 = vpack.c.bf16 %v731_v29, %v730_v28  ;;  %v736_v53 = vld [vmem:[%s4183_s4 + $0x30] sm:$0xff]  ;;  %v737_v54 = vld [vmem:[%s4183_s4 + $0x38] sm:$0xff] }
  0x21   :  { %123 = vperm.xlu1 %2695, %v42_v9   ;;  %120 = vperm.xlu0 %2694, %v41_v10  }
  0x25   :  { %129 = vperm.xlu1 %2695, %v44_v12   ;;  %126 = vperm.xlu0 %2694, %v43_v13  }
  0x29   :  { %135 = vperm.xlu1 %2695, %v46_v14   ;;  %132 = vperm.xlu0 %2694, %v45_v15  }
  0x2d   :  { %141 = vperm.xlu1 %2695, %v48_v16   ;;  %138 = vperm.xlu0 %2694, %v47_v17  }
  0x31   :  { %147 = vperm.xlu1 %2695, %v50_v23   ;;  %144 = vperm.xlu0 %2694, %v49_v24  }
  0x35   :  { %2702 = vperm.xlu1 %2695, %v2701_v25   ;;  %2697 = vperm.xlu0 %2694, %v2696_v26  }
  0x39   :  { %2712 = vperm.xlu1 %2695, %v2711_v31   ;;  %2707 = vperm.xlu0 %2694, %v2706_v32   ;;  %v732_v31 = vld [vmem:[%s4183_s4 + $0x10] sm:$0xff] }
  0x3d   :  { %2722 = vperm.xlu1 %2695, %v2721_v37   ;;  %2717 = vperm.xlu0 %2694, %v2716_v38  }
  0x41   :  { %2732 = vperm.xlu1 %2695, %v2731_v43   ;;  %2727 = vperm.xlu0 %2694, %v2726_v44  }
  0x94   :  { %v109_v50 = vpop.permute.xlu1 %108  ;;  %v103_v51 = vpop.permute.xlu0 %102 }
  0x95   :  { %vm149_vm1 = vcmp.eq.s32.totalorder %v2969_v49, %v103_v51  ;;  %vm151_vm2 = vcmp.eq.s32.totalorder %v2969_v49, %v109_v50  ;;  %v734_v50 = vld [vmem:[%s4183_s4 + $0x20] sm:$0xff]  ;;  %v735_v51 = vld [vmem:[%s4183_s4 + $0x28] sm:$0xff] }
  0x96   :  { %v2245_v52 = vsel %vm149_vm1, 1.0, %v2852_v18  ;;  %v2247_v57 = vsel %vm151_vm2, 1.0, %v2852_v18  ;;  %vm408_vm2 = vcmask 523264  }
  0x97   :  { %2444 = vmatprep.mubr.msk.f32.mxu0 %vm199_vm0, %v2245_v52  ;;  %v2632_v52 = vpack.c.bf16 %v735_v51, %v734_v50 }
  0x98   :  { %v112_v55 = vpop.permute.xlu1 %111  ;;  %v106_v56 = vpop.permute.xlu0 %105 }
  0x99   :  { %vm152_vm3 = vcmp.eq.s32.totalorder %v2969_v49, %v112_v55  ;;  %vm150_vm4 = vcmp.eq.s32.totalorder %v2969_v49, %v106_v56  ;;  %v2636_v55 = vpack.c.bf16 %v737_v54, %v736_v53  ;;  %v3080_v56 = vld [vmem:[%s4182_s3] ss:$0 sm:$0xff]  ;;  %s2853_s3 = smov [#allocation5]  }
  0x9a   :  { %v2246_v59 = vsel %vm150_vm4, 1.0, %v2852_v18  ;;  %v2248_v62 = vsel %vm152_vm3, 1.0, %v2852_v18 }
  0x9b   :  { %2445 = vmatmul.mubr.msk.f32.vlgmr.msra.gmra.mrb[0].mxu0 %vm199_vm0, %v2246_v59 }
  0x9c   :  { %v118_v63 = vpop.permute.xlu1 %117  ;;  %v115_v0 = vpop.permute.xlu0 %114  ;;  %2447 = vmatprep.mubr.msk.f32.mxu0 %vm199_vm0, %v2247_v57  ;;  %2611 = vmatpush3.bf16.msra.mxu0 %v2608_v47 }
  0x9d   :  { %vm153_vm5 = vcmp.eq.s32.totalorder %v2969_v49, %v115_v0  ;;  %2613 = vmatprep.subr.bf16.mxu0 %v2612_v58  ;;  %vm154_vm6 = vcmp.eq.s32.totalorder %v2969_v49, %v118_v63 }
  0x9e   :  { %v2249_v2 = vsel %vm153_vm5, 1.0, %v2852_v18  ;;  %v2250_v8 = vsel %vm154_vm6, 1.0, %v2852_v18 }
  0x9f   :  { %2448 = vmatmul.mubr.msk.f32.gmra.mrb[2].mxu0 %vm199_vm0, %v2248_v62 }
  0xa0   :  { %v124_v5 = vpop.permute.xlu1 %123  ;;  %2450 = vmatprep.mubr.msk.f32.mxu0 %vm199_vm0, %v2249_v2  ;;  %v121_v6 = vpop.permute.xlu0 %120  ;;  %2615 = vmatpush3.bf16.msra.mxu0 %v2612_v58 }
  0xa1   :  { %vm155_vm7 = vcmp.eq.s32.totalorder %v2969_v49, %v121_v6  ;;  %2617 = vmatprep.subr.bf16.mxu0 %v2616_v1  ;;  %vm156_vm8 = vcmp.eq.s32.totalorder %v2969_v49, %v124_v5 }
  0xa2   :  { %v2251_v9 = vsel %vm155_vm7, 1.0, %v2852_v18  ;;  %v2252_v12 = vsel %vm156_vm8, 1.0, %v2852_v18 }
  0xa3   :  { %2451 = vmatmul.mubr.msk.f32.gmra.mrb[4].mxu0 %vm199_vm0, %v2250_v8 }
  0xa4   :  { %v130_v10 = vpop.permute.xlu1 %129  ;;  %2453 = vmatprep.mubr.msk.f32.mxu0 %vm199_vm0, %v2251_v9  ;;  %v127_v11 = vpop.permute.xlu0 %126  ;;  %2619 = vmatpush3.bf16.msra.mxu0 %v2616_v1 }
  0xa5   :  { %vm157_vm9 = vcmp.eq.s32.totalorder %v2969_v49, %v127_v11  ;;  %2621 = vmatprep.subr.bf16.mxu0 %v2620_v7  ;;  %vm158_vm10 = vcmp.eq.s32.totalorder %v2969_v49, %v130_v10 }
  0xa6   :  { %v2253_v13 = vsel %vm157_vm9, 1.0, %v2852_v18  ;;  %v2254_v16 = vsel %vm158_vm10, 1.0, %v2852_v18 }
  0xa7   :  { %2454 = vmatmul.mubr.msk.f32.gmra.mrb[6].mxu0 %vm199_vm0, %v2252_v12 }
  0xa8   :  { %v136_v14 = vpop.permute.xlu1 %135  ;;  %2456 = vmatprep.mubr.msk.f32.mxu0 %vm199_vm0, %v2253_v13  ;;  %v133_v15 = vpop.permute.xlu0 %132  ;;  %2623 = vmatpush3.bf16.msra.mxu0 %v2620_v7 }
  0xa9   :  { %vm159_vm11 = vcmp.eq.s32.totalorder %v2969_v49, %v133_v15  ;;  %vm160_vm12 = vcmp.eq.s32.totalorder %v2969_v49, %v136_v14  ;;  %2625 = vmatprep.subr.bf16.mxu0 %v2624_v30 }
  0xaa   :  { %v2255_v17 = vsel %vm159_vm11, 1.0, %v2852_v18  ;;  %v2256_v21 = vsel %vm160_vm12, 1.0, %v2852_v18 }
  0xab   :  { %2457 = vmatmul.mubr.msk.f32.gmra.mrb[8].mxu0 %vm199_vm0, %v2254_v16 }
  0xac   :  { %v142_v19 = vpop.permute.xlu1 %141  ;;  %2459 = vmatprep.mubr.msk.f32.mxu0 %vm199_vm0, %v2255_v17  ;;  %v139_v20 = vpop.permute.xlu0 %138 }
  0xad   :  { %vm161_vm13 = vcmp.eq.s32.totalorder %v2969_v49, %v139_v20  ;;  %vm162_vm14 = vcmp.eq.s32.totalorder %v2969_v49, %v142_v19 }
  0xae   :  { %v2257_v22 = vsel %vm161_vm13, 1.0, %v2852_v18  ;;  %v2258_v25 = vsel %vm162_vm14, 1.0, %v2852_v18 }
  0xaf   :  { %2460 = vmatmul.mubr.msk.f32.gmra.mrb[10].mxu0 %vm199_vm0, %v2256_v21 }
  0xb0   :  { %v148_v23 = vpop.permute.xlu1 %147  ;;  %2462 = vmatprep.mubr.msk.f32.mxu0 %vm199_vm0, %v2257_v22  ;;  %v145_v24 = vpop.permute.xlu0 %144 }
  0xb1   :  { %vm163_vm15 = vcmp.eq.s32.totalorder %v2969_v49, %v145_v24  ;;  %vm164_vm1 = vcmp.eq.s32.totalorder %v2969_v49, %v148_v23 }
  0xb2   :  { %v2259_v26 = vsel %vm163_vm15, 1.0, %v2852_v18  ;;  %v2260_v27 = vsel %vm164_vm1, 1.0, %v2852_v18  ;;  %v733_v18 = vld [vmem:[%s4183_s4 + $0x18] sm:$0xff]  ;;  %s2217_s4 = sshll.u32 %s2853_s3, 4  ;;  %s2218_s4 = int_to_ptr.vmem [resolvable:$true] %s2217_s4 }
  0xb3   :  { %2463 = vmatmul.mubr.msk.f32.gmra.mrb[12].mxu0 %vm199_vm0, %v2258_v25  ;;  %v2628_v34 = vpack.c.bf16 %v733_v18, %v732_v31  ;;  %s2822_s21 = scalar_lea.vmem %s2218_s4, 2048  ;;  %p2827_p9 = scmp.lt.s32.totalorder %s2218_s4, %s2218_s4 }
  0xb4   :  { %2465 = vmatprep.mubr.msk.f32.mxu0 %vm199_vm0, %v2259_v26  ;;  %v2698_v10 = vpop.permute.xlu0 %2697  ;;  %v2703_v21 = vpop.permute.xlu1 %2702  ;;  %p2823_p8 = scmp.ne.s32.totalorder %s2218_s4, %s2822_s21  ;;  %p2828_p10 = scmp.lt.s32.totalorder %s2822_s21, %s2822_s21 }
  0xb5   :  { %v2699_v17 = vunpack.i.l.bf16 %v2698_v10  ;;  %v2700_v22 = vunpack.i.h.bf16 %v2698_v10  ;;  %v2704_v31 = vunpack.i.l.bf16 %v2703_v21 }
  0xb6   :  { %p2829_p11 = por %p2828_p10, %p2827_p9 }
  0xb7   :  { %2466 = vmatmul.mubr.msk.f32.gmra.mrb[14].mxu0 %vm199_vm0, %v2260_v27  ;;  %vm3156_vm0 = vmpackc.low %vm408_vm2, %vm408_vm2 }
  0xb8   :  { %p2830_p12 = pnand %p2829_p11, %p2823_p8 }
 0x16e   :  { %v2446_v32 = vpop.f32.mrb[0].mxu0 }
 0x16f   :  { %v314_v33 = vpop.f32.mrb[1].mxu0 }
 0x170   :  { %2484 = vmatprep.mubr.msk.f32.mxu0 %vm408_vm2, %v314_v33  ;;  %v2705_v33 = vunpack.i.h.bf16 %v2703_v21 }
 0x171   :  { %2485 = vmatmul.mubr.msk.f32.vlgmr.msra.gmra.mrb[16].mxu0 %vm408_vm2, %v2446_v32 }
 0x172   :  { %v2449_v35 = vpop.f32.mrb[2].mxu0  ;;  %2627 = vmatpush3.bf16.msra.mxu0 %v2624_v30 }
 0x173   :  { %v324_v36 = vpop.f32.mrb[3].mxu0  ;;  %2629 = vmatprep.subr.bf16.mxu0 %v2628_v34 }
 0x174   :  { %2487 = vmatprep.mubr.msk.f32.mxu0 %vm408_vm2, %v324_v36 }
 0x175   :  { %2488 = vmatmul.mubr.msk.f32.gmra.mrb[18].mxu0 %vm408_vm2, %v2449_v35 }
 0x176   :  { %v2452_v37 = vpop.f32.mrb[4].mxu0  ;;  %2631 = vmatpush3.bf16.msra.mxu0 %v2628_v34  ;;  %v2708_v34 = vpop.permute.xlu0 %2707 }
 0x177   :  { %v334_v38 = vpop.f32.mrb[5].mxu0  ;;  %2633 = vmatprep.subr.bf16.mxu0 %v2632_v52 }
 0x178   :  { %2490 = vmatprep.mubr.msk.f32.mxu0 %vm408_vm2, %v334_v38 }
 0x179   :  { %2491 = vmatmul.mubr.msk.f32.gmra.mrb[20].mxu0 %vm408_vm2, %v2452_v37 }
 0x17a   :  { %v2455_v39 = vpop.f32.mrb[6].mxu0  ;;  %2635 = vmatpush3.bf16.msra.mxu0 %v2632_v52 }
 0x17b   :  { %v344_v40 = vpop.f32.mrb[7].mxu0  ;;  %2637 = vmatprep.subr.bf16.mxu0 %v2636_v55 }
 0x17c   :  { %2493 = vmatprep.mubr.msk.f32.mxu0 %vm408_vm2, %v344_v40 }
 0x17d   :  { %2494 = vmatmul.mubr.msk.f32.gmra.mrb[22].mxu0 %vm408_vm2, %v2455_v39 }
 0x17e   :  { %v2458_v41 = vpop.f32.mrb[8].mxu0  ;;  %2639 = vmatpush3.bf16.msra.mxu0 %v2636_v55 }
 0x17f   :  { %v354_v42 = vpop.f32.mrb[9].mxu0 }
 0x180   :  { %2496 = vmatprep.mubr.msk.f32.mxu0 %vm408_vm2, %v354_v42 }
 0x181   :  { %2497 = vmatmul.mubr.msk.f32.gmra.mrb[24].mxu0 %vm408_vm2, %v2458_v41 }
 0x182   :  { %v2461_v43 = vpop.f32.mrb[10].mxu0 }
 0x183   :  { %v364_v44 = vpop.f32.mrb[11].mxu0 }
 0x184   :  { %2499 = vmatprep.mubr.msk.f32.mxu0 %vm408_vm2, %v364_v44 }
 0x185   :  { %2500 = vmatmul.mubr.msk.f32.gmra.mrb[26].mxu0 %vm408_vm2, %v2461_v43  ;;  %v2709_v43 = vunpack.i.l.bf16 %v2708_v34 }
 0x186   :  { %v2464_v45 = vpop.f32.mrb[12].mxu0 }
 0x187   :  { %v374_v46 = vpop.f32.mrb[13].mxu0 }
 0x188   :  { %2502 = vmatprep.mubr.msk.f32.mxu0 %vm408_vm2, %v374_v46  ;;  %v2713_v46 = vpop.permute.xlu1 %2712 }
 0x189   :  { %2503 = vmatmul.mubr.msk.f32.gmra.mrb[28].mxu0 %vm408_vm2, %v2464_v45 }
 0x18a   :  { %v2467_v47 = vpop.f32.mrb[14].mxu0 }
 0x18b   :  { %v384_v48 = vpop.f32.mrb[15].mxu0 }
 0x18c   :  { %2505 = vmatprep.mubr.msk.f32.mxu0 %vm408_vm2, %v384_v48  ;;  %v2723_v10 = vpop.permute.xlu1 %2722 }
 0x18d   :  { %2506 = vmatmul.mubr.msk.f32.gmra.mrb[30].mxu0 %vm408_vm2, %v2467_v47  ;;  %v2710_v47 = vunpack.i.h.bf16 %v2708_v34 }
 0x244   :  { %v2486_v57 = vpop.f32.mrb[16].mxu0 }
 0x245   :  { %v529_v58 = vadd.f32 %v2486_v57, %v3080_v56  ;;  %v523_v59 = vpop.f32.mrb[17].mxu0 }
 0x246   :  { %v524_v60 = vadd.f32 %v3080_v56, %v523_v59 }
 0x247   :  { %v603_v61 = vmul.f32 3.0, %v529_v58  ;;  %v2714_v58 = vunpack.i.l.bf16 %v2713_v46 }
 0x248   :  { %v602_v62 = vmul.f32 3.0, %v524_v60  ;;  %v2489_v63 = vpop.f32.mrb[18].mxu0 }
 0x249   :  { %2736 = vtanh.f32 %v603_v61  ;;  %v539_v0 = vadd.f32 %v2489_v63, %v3080_v56  ;;  %v533_v1 = vpop.f32.mrb[19].mxu0  ;;  %v2715_v61 = vunpack.i.h.bf16 %v2713_v46 }
 0x24a   :  { %2738 = vtanh.f32 %v602_v62  ;;  %v534_v2 = vadd.f32 %v3080_v56, %v533_v1  ;;  %v2718_v62 = vpop.permute.xlu0 %2717 }
 0x24b   :  { %v605_v3 = vmul.f32 3.0, %v539_v0 }
 0x24c   :  { %v604_v4 = vmul.f32 3.0, %v534_v2  ;;  %v2492_v5 = vpop.f32.mrb[20].mxu0 }
 0x24d   :  { %2740 = vtanh.f32 %v605_v3  ;;  %v549_v6 = vadd.f32 %v2492_v5, %v3080_v56  ;;  %v543_v7 = vpop.f32.mrb[21].mxu0 }
 0x24e   :  { %2742 = vtanh.f32 %v604_v4  ;;  %v544_v8 = vadd.f32 %v3080_v56, %v543_v7  ;;  %v2719_v7 = vunpack.i.l.bf16 %v2718_v62 }
 0x24f   :  { %v607_v9 = vmul.f32 3.0, %v549_v6 }
 0x250   :  { %v606_v11 = vmul.f32 3.0, %v544_v8  ;;  %v2495_v12 = vpop.f32.mrb[22].mxu0 }
 0x251   :  { %2744 = vtanh.f32 %v607_v9  ;;  %v559_v13 = vadd.f32 %v2495_v12, %v3080_v56  ;;  %v553_v14 = vpop.f32.mrb[23].mxu0 }
 0x252   :  { %2746 = vtanh.f32 %v606_v11  ;;  %v554_v15 = vadd.f32 %v3080_v56, %v553_v14  ;;  %v2720_v11 = vunpack.i.h.bf16 %v2718_v62 }
 0x253   :  { %v2737_v16 = vpop.eup %2736  ;;  %v609_v19 = vmul.f32 3.0, %v559_v13 }
 0x254   :  { %v2739_v20 = vpop.eup %2738  ;;  %v608_v23 = vmul.f32 3.0, %v554_v15  ;;  %v2498_v24 = vpop.f32.mrb[24].mxu0  ;;  %v3091_v28 = vmul.f32 %v2737_v16, %v2700_v22  ;;  %v2724_v15 = vunpack.i.l.bf16 %v2723_v10 }
 0x255   :  { %2748 = vtanh.f32 %v609_v19  ;;  %v569_v25 = vadd.f32 %v2498_v24, %v3080_v56  ;;  %v563_v26 = vpop.f32.mrb[25].mxu0  ;;  %v714_v27 = vmul.f32 %v2739_v20, %v2699_v17  ;;  %v2725_v17 = vunpack.i.h.bf16 %v2723_v10  ;;  %v2728_v19 = vpop.permute.xlu0 %2727 }
 0x256   :  { %2750 = vtanh.f32 %v608_v23  ;;  %v564_v29 = vadd.f32 %v3080_v56, %v563_v26  ;;  %v2729_v23 = vunpack.i.l.bf16 %v2728_v19  ;;  %v2730_v26 = vunpack.i.h.bf16 %v2728_v19 }
 0x257   :  { %v2741_v30 = vpop.eup %2740  ;;  %v611_v18 = vmul.f32 3.0, %v569_v25  ;;  %2524 = vmatprep.mubr.msk.f32.mxu0 %vm408_vm2, %v714_v27  ;;  %2580 = vmatprep.mubr.msk.f32.mxu1 %vm408_vm2, %v714_v27  ;;  %v2733_v25 = vpop.permute.xlu1 %2732 }
 0x258   :  { %v2743_v32 = vpop.eup %2742  ;;  %v610_v35 = vmul.f32 3.0, %v564_v29  ;;  %v2501_v36 = vpop.f32.mrb[26].mxu0  ;;  %2525 = vmatmul.mubr.msk.f32.vlgmr.msra.gmra.mrb[32].mxu0 %vm408_vm2, %v3091_v28  ;;  %v3102_v41 = vmul.f32 %v2741_v30, %v2705_v33 }
 0x259   :  { %2752 = vtanh.f32 %v611_v18  ;;  %v579_v37 = vadd.f32 %v2501_v36, %v3080_v56  ;;  %v573_v38 = vpop.f32.mrb[27].mxu0  ;;  %v3099_v39 = vmul.f32 %v2743_v32, %v2704_v31  ;;  %v2734_v31 = vunpack.i.l.bf16 %v2733_v25 }
 0x25a   :  { %2754 = vtanh.f32 %v610_v35  ;;  %v574_v40 = vadd.f32 %v3080_v56, %v573_v38  ;;  %v2735_v32 = vunpack.i.h.bf16 %v2733_v25 }
 0x25b   :  { %v2745_v42 = vpop.eup %2744  ;;  %v613_v44 = vmul.f32 3.0, %v579_v37  ;;  %2527 = vmatprep.mubr.msk.f32.mxu0 %vm408_vm2, %v3099_v39 }
 0x25c   :  { %v2747_v45 = vpop.eup %2746  ;;  %v612_v48 = vmul.f32 3.0, %v574_v40  ;;  %v2504_v50 = vpop.f32.mrb[28].mxu0  ;;  %2528 = vmatmul.mubr.msk.f32.gmra.mrb[34].mxu0 %vm408_vm2, %v3102_v41  ;;  %v3112_v55 = vmul.f32 %v2745_v42, %v2710_v47 }
 0x25d   :  { %2756 = vtanh.f32 %v613_v44  ;;  %v589_v51 = vadd.f32 %v2504_v50, %v3080_v56  ;;  %v583_v52 = vpop.f32.mrb[29].mxu0  ;;  %v3109_v53 = vmul.f32 %v2747_v45, %v2709_v43 }
 0x25e   :  { %2758 = vtanh.f32 %v612_v48  ;;  %v584_v54 = vadd.f32 %v3080_v56, %v583_v52 }
 0x25f   :  { %v2749_v57 = vpop.eup %2748  ;;  %v615_v59 = vmul.f32 3.0, %v589_v51  ;;  %2530 = vmatprep.mubr.msk.f32.mxu0 %vm408_vm2, %v3109_v53 }
 0x260   :  { %v2751_v60 = vpop.eup %2750  ;;  %v614_v63 = vmul.f32 3.0, %v584_v54  ;;  %v2507_v0 = vpop.f32.mrb[30].mxu0  ;;  %2531 = vmatmul.mubr.msk.f32.gmra.mrb[36].mxu0 %vm408_vm2, %v3112_v55  ;;  %v3122_v5 = vmul.f32 %v2749_v57, %v2715_v61 }
 0x261   :  { %2760 = vtanh.f32 %v615_v59  ;;  %v599_v1 = vadd.f32 %v2507_v0, %v3080_v56  ;;  %v593_v2 = vpop.f32.mrb[31].mxu0  ;;  %v3119_v3 = vmul.f32 %v2751_v60, %v2714_v58 }
 0x262   :  { %2762 = vtanh.f32 %v614_v63  ;;  %v594_v4 = vadd.f32 %v3080_v56, %v593_v2 }
 0x263   :  { %v2753_v6 = vpop.eup %2752  ;;  %v617_v8 = vmul.f32 3.0, %v599_v1  ;;  %2533 = vmatprep.mubr.msk.f32.mxu0 %vm408_vm2, %v3119_v3 }
 0x264   :  { %v2755_v9 = vpop.eup %2754  ;;  %v616_v12 = vmul.f32 3.0, %v594_v4  ;;  %2534 = vmatmul.mubr.msk.f32.gmra.mrb[38].mxu0 %vm408_vm2, %v3122_v5  ;;  %v3130_v56 = vmul.f32 %v2753_v6, %v2720_v11 }
 0x265   :  { %2764 = vtanh.f32 %v617_v8  ;;  %v3128_v13 = vmul.f32 %v2755_v9, %v2719_v7 }
 0x266   :  { %2766 = vtanh.f32 %v616_v12 }
 0x267   :  { %v2757_v14 = vpop.eup %2756  ;;  %2536 = vmatprep.mubr.msk.f32.mxu0 %vm408_vm2, %v3128_v13 }
 0x268   :  { %v2759_v16 = vpop.eup %2758  ;;  %2537 = vmatmul.mubr.msk.f32.gmra.mrb[40].mxu0 %vm408_vm2, %v3130_v56  ;;  %v3138_v21 = vmul.f32 %v2757_v14, %v2725_v17 }
 0x269   :  { %v3136_v20 = vmul.f32 %v2759_v16, %v2724_v15 }
 0x26b   :  { %v2761_v22 = vpop.eup %2760  ;;  %2539 = vmatprep.mubr.msk.f32.mxu0 %vm408_vm2, %v3136_v20 }
 0x26c   :  { %v2763_v24 = vpop.eup %2762  ;;  %2540 = vmatmul.mubr.msk.f32.gmra.mrb[42].mxu0 %vm408_vm2, %v3138_v21  ;;  %v3146_v29 = vmul.f32 %v2761_v22, %v2730_v26 }
 0x26d   :  { %v3144_v27 = vmul.f32 %v2763_v24, %v2729_v23 }
 0x26f   :  { %v2765_v30 = vpop.eup %2764  ;;  %2542 = vmatprep.mubr.msk.f32.mxu0 %vm408_vm2, %v3144_v27 }
 0x270   :  { %v2767_v18 = vpop.eup %2766  ;;  %2543 = vmatmul.mubr.msk.f32.gmra.mrb[44].mxu0 %vm408_vm2, %v3146_v29  ;;  %v729_v34 = vmul.f32 %v2765_v30, %v2735_v32 }
 0x271   :  { %v728_v33 = vmul.f32 %v2767_v18, %v2734_v31 }
 0x273   :  { %2545 = vmatprep.mubr.msk.f32.mxu0 %vm408_vm2, %v728_v33 }
 0x274   :  { %2546 = vmatmul.mubr.msk.f32.gmra.mrb[46].mxu0 %vm408_vm2, %v729_v34 }
 0x32b   :  { %v2526_v35 = vpop.f32.mrb[32].mxu0 }
 0x32c   :  { %v852_v36 = vpop.f32.mrb[33].mxu0 }
 0x32d   :  { %v2640_v38 = vpack.c.bf16 %v2526_v35, %v852_v36 }
 0x32f   :  { %v2529_v40 = vpop.f32.mrb[34].mxu0  ;;  %2642 = vmatprep.subr.msk.bf16.mxu1 %vm3156_vm0, %v2640_v38 }
 0x330   :  { %v862_v42 = vpop.f32.mrb[35].mxu0  ;;  %2645 = vmatpush3.bf16.xpose.msk.msra.mxu1 %vm3156_vm0, %v2640_v38 }
 0x331   :  { %v2646_v43 = vpack.c.bf16 %v2529_v40, %v862_v42 }
 0x333   :  { %v2532_v44 = vpop.f32.mrb[36].mxu0  ;;  %2648 = vmatprep.subr.msk.bf16.mxu1 %vm3156_vm0, %v2646_v43 }
 0x334   :  { %v872_v45 = vpop.f32.mrb[37].mxu0 }
 0x335   :  { %v2652_v46 = vpack.c.bf16 %v2532_v44, %v872_v45 }
 0x337   :  { %v2535_v47 = vpop.f32.mrb[38].mxu0 }
 0x338   :  { %v882_v48 = vpop.f32.mrb[39].mxu0  ;;  %2651 = vmatpush3.bf16.xpose.msk.msra.mxu1 %vm3156_vm0, %v2646_v43 }
 0x339   :  { %v2658_v50 = vpack.c.bf16 %v2535_v47, %v882_v48  ;;  %2654 = vmatprep.subr.msk.bf16.mxu1 %vm3156_vm0, %v2652_v46 }
 0x33b   :  { %v2538_v51 = vpop.f32.mrb[40].mxu0 }
 0x33c   :  { %v892_v52 = vpop.f32.mrb[41].mxu0 }
 0x33d   :  { %v2664_v54 = vpack.c.bf16 %v2538_v51, %v892_v52 }
 0x33f   :  { %v2541_v57 = vpop.f32.mrb[42].mxu0 }
 0x340   :  { %v902_v58 = vpop.f32.mrb[43].mxu0  ;;  %2657 = vmatpush3.bf16.xpose.msk.msra.mxu1 %vm3156_vm0, %v2652_v46 }
 0x341   :  { %v2670_v59 = vpack.c.bf16 %v2541_v57, %v902_v58  ;;  %2660 = vmatprep.subr.msk.bf16.mxu1 %vm3156_vm0, %v2658_v50 }
 0x343   :  { %v2544_v60 = vpop.f32.mrb[44].mxu0 }
 0x344   :  { %v912_v61 = vpop.f32.mrb[45].mxu0 }
 0x345   :  { %v2676_v62 = vpack.c.bf16 %v2544_v60, %v912_v61 }
 0x347   :  { %v2547_v63 = vpop.f32.mrb[46].mxu0 }
 0x348   :  { %v922_v0 = vpop.f32.mrb[47].mxu0  ;;  %2663 = vmatpush3.bf16.xpose.msk.msra.mxu1 %vm3156_vm0, %v2658_v50 }
 0x349   :  { %v2682_v1 = vpack.c.bf16 %v2547_v63, %v922_v0  ;;  %2666 = vmatprep.subr.msk.bf16.mxu1 %vm3156_vm0, %v2664_v54 }
 0x350   :  { %2669 = vmatpush3.bf16.xpose.msk.msra.mxu1 %vm3156_vm0, %v2664_v54 }
 0x351   :  { %2672 = vmatprep.subr.msk.bf16.mxu1 %vm3156_vm0, %v2670_v59 }
 0x358   :  { %2675 = vmatpush3.bf16.xpose.msk.msra.mxu1 %vm3156_vm0, %v2670_v59 }
 0x359   :  { %2678 = vmatprep.subr.msk.bf16.mxu1 %vm3156_vm0, %v2676_v62 }
 0x360   :  { %2681 = vmatpush3.bf16.xpose.msk.msra.mxu1 %vm3156_vm0, %v2676_v62 }
 0x361   :  { %2684 = vmatprep.subr.msk.bf16.mxu1 %vm3156_vm0, %v2682_v1 }
 0x368   :  { %2687 = vmatpush3.bf16.xpose.msk.msra.mxu1 %vm3156_vm0, %v2682_v1 }
 0x36f   :  { %2581 = vmatmul.mubr.msk.f32.vlgmr.msra.gmra.mrb[0].mxu1 %vm408_vm2, %v3091_v28 }
 0x370   :  { %2583 = vmatprep.mubr.msk.f32.mxu1 %vm408_vm2, %v3099_v39 }
 0x373   :  { %2584 = vmatmul.mubr.msk.f32.gmra.mrb[2].mxu1 %vm408_vm2, %v3102_v41 }
 0x374   :  { %2586 = vmatprep.mubr.msk.f32.mxu1 %vm408_vm2, %v3109_v53 }
 0x377   :  { %2587 = vmatmul.mubr.msk.f32.gmra.mrb[4].mxu1 %vm408_vm2, %v3112_v55 }
 0x378   :  { %2589 = vmatprep.mubr.msk.f32.mxu1 %vm408_vm2, %v3119_v3 }
 0x37b   :  { %2590 = vmatmul.mubr.msk.f32.gmra.mrb[6].mxu1 %vm408_vm2, %v3122_v5 }
 0x37c   :  { %2592 = vmatprep.mubr.msk.f32.mxu1 %vm408_vm2, %v3128_v13 }
 0x37f   :  { %2593 = vmatmul.mubr.msk.f32.gmra.mrb[8].mxu1 %vm408_vm2, %v3130_v56 }
 0x380   :  { %2595 = vmatprep.mubr.msk.f32.mxu1 %vm408_vm2, %v3136_v20 }
 0x383   :  { %2596 = vmatmul.mubr.msk.f32.gmra.mrb[10].mxu1 %vm408_vm2, %v3138_v21 }
 0x384   :  { %2598 = vmatprep.mubr.msk.f32.mxu1 %vm408_vm2, %v3144_v27 }
 0x387   :  { %2599 = vmatmul.mubr.msk.f32.gmra.mrb[12].mxu1 %vm408_vm2, %v3146_v29 }
 0x388   :  { %2601 = vmatprep.mubr.msk.f32.mxu1 %vm408_vm2, %v728_v33 }
 0x38b   :  { %2602 = vmatmul.mubr.msk.f32.gmra.mrb[14].mxu1 %vm408_vm2, %v729_v34 }
 0x442   :  { %v2582_v28 = vpop.f32.mrb[0].mxu1 }
 0x443   :  { %v1125_v39 = vmul.f32 3.0, %v2582_v28  ;;  %v1045_v41 = vpop.f32.mrb[1].mxu1 }
 0x444   :  { %v1124_v53 = vmul.f32 3.0, %v1045_v41 }
 0x445   :  { %2768 = vtanh.f32 %v1125_v39 }
 0x446   :  { %2770 = vtanh.f32 %v1124_v53  ;;  %v2585_v55 = vpop.f32.mrb[2].mxu1 }
 0x447   :  { %v1127_v2 = vmul.f32 3.0, %v2585_v55  ;;  %v1055_v3 = vpop.f32.mrb[3].mxu1 }
 0x448   :  { %v1126_v4 = vmul.f32 3.0, %v1055_v3 }
 0x449   :  { %2772 = vtanh.f32 %v1127_v2 }
 0x44a   :  { %v2588_v5 = vpop.f32.mrb[4].mxu1  ;;  %2774 = vtanh.f32 %v1126_v4 }
 0x44b   :  { %v1065_v6 = vpop.f32.mrb[5].mxu1  ;;  %v1129_v7 = vmul.f32 3.0, %v2588_v5 }
 0x44c   :  { %v1128_v8 = vmul.f32 3.0, %v1065_v6 }
 0x44e   :  { %2776 = vtanh.f32 %v1128_v8  ;;  %v2591_v9 = vpop.f32.mrb[6].mxu1 }
 0x44f   :  { %v2769_v10 = vpop.eup %2768  ;;  %v1075_v11 = vpop.f32.mrb[7].mxu1  ;;  %2778 = vtanh.f32 %v1129_v7  ;;  %v1131_v56 = vmul.f32 3.0, %v2591_v9 }
 0x450   :  { %v2771_v12 = vpop.eup %2770  ;;  %v3220_v13 = vmax.f32 %v2769_v10, 0.0  ;;  %v1130_v14 = vmul.f32 3.0, %v1075_v11 }
 0x451   :  { %v3222_v15 = vmax.f32 %v2771_v12, 0.0 }
 0x452   :  { %2780 = vtanh.f32 %v1130_v14  ;;  %1174 = vmax.xlane.f32.xlu1 %v3220_v13  ;;  %v2594_v16 = vpop.f32.mrb[8].mxu1 }
 0x453   :  { %v2773_v17 = vpop.eup %2772  ;;  %1172 = vmax.xlane.f32.xlu0 %v3222_v15  ;;  %v1085_v19 = vpop.f32.mrb[9].mxu1  ;;  %2782 = vtanh.f32 %v1131_v56  ;;  %v1133_v21 = vmul.f32 3.0, %v2594_v16 }
 0x454   :  { %v3226_v20 = vmax.f32 %v2773_v17, 0.0  ;;  %v1132_v22 = vmul.f32 3.0, %v1085_v19  ;;  %v2775_v23 = vpop.eup %2774 }
 0x455   :  { %v3229_v30 = vmax.f32 %v2775_v23, 0.0 }
 0x456   :  { %2784 = vtanh.f32 %v1132_v22  ;;  %v2597_v24 = vpop.f32.mrb[10].mxu1 }
 0x457   :  { %1178 = vmax.xlane.f32.xlu0 %v3226_v20  ;;  %v1095_v25 = vpop.f32.mrb[11].mxu1  ;;  %2786 = vtanh.f32 %v1133_v21  ;;  %v1135_v27 = vmul.f32 3.0, %v2597_v24 }
 0x458   :  { %v2777_v26 = vpop.eup %2776  ;;  %v1134_v29 = vmul.f32 3.0, %v1095_v25 }
 0x459   :  { %v3231_v31 = vmax.f32 %v2777_v26, 0.0  ;;  %v2779_v18 = vpop.eup %2778 }
 0x45a   :  { %2788 = vtanh.f32 %v1134_v29  ;;  %v2600_v32 = vpop.f32.mrb[12].mxu1  ;;  %v3235_v37 = vmax.f32 %v2779_v18, 0.0 }
 0x45b   :  { %4209 = vst [vmem:[#allocation8_spill] sm:$0xff] %v3231_v31  ;;  %1176 = vmax.xlane.f32.xlu0 %v3229_v30  ;;  %1180 = vmax.xlane.f32.xlu1 %v3231_v31  ;;  %v1105_v33 = vpop.f32.mrb[13].mxu1  ;;  %2790 = vtanh.f32 %v1135_v27  ;;  %v1137_v35 = vmul.f32 3.0, %v2600_v32 }
 0x45c   :  { %v2781_v34 = vpop.eup %2780  ;;  %v1136_v36 = vmul.f32 3.0, %v1105_v33 }
 0x45d   :  { %v3237_v38 = vmax.f32 %v2781_v34, 0.0  ;;  %v2783_v40 = vpop.eup %2782 }
 0x45e   :  { %2792 = vtanh.f32 %v1136_v36  ;;  %v2603_v42 = vpop.f32.mrb[14].mxu1  ;;  %v3241_v47 = vmax.f32 %v2783_v40, 0.0 }
 0x45f   :  { %4210 = vst [vmem:[#allocation9_spill] sm:$0xff] %v3237_v38  ;;  %1182 = vmax.xlane.f32.xlu0 %v3235_v37  ;;  %1184 = vmax.xlane.f32.xlu1 %v3237_v38  ;;  %v1115_v43 = vpop.f32.mrb[15].mxu1  ;;  %2794 = vtanh.f32 %v1137_v35  ;;  %v1139_v45 = vmul.f32 3.0, %v2603_v42 }
 0x460   :  { %v2785_v44 = vpop.eup %2784  ;;  %v1138_v46 = vmul.f32 3.0, %v1115_v43  ;;  %4211 = vst [vmem:[#allocation10_spill] sm:$0xff] %v3241_v47 }
 0x461   :  { %v3243_v48 = vmax.f32 %v2785_v44, 0.0  ;;  %v2787_v50 = vpop.eup %2786 }
 0x462   :  { %2796 = vtanh.f32 %v1138_v46  ;;  %v3247_v52 = vmax.f32 %v2787_v50, 0.0 }
 0x463   :  { %4212 = vst [vmem:[#allocation11_spill] sm:$0xff] %v3243_v48  ;;  %1186 = vmax.xlane.f32.xlu0 %v3241_v47  ;;  %1188 = vmax.xlane.f32.xlu1 %v3243_v48  ;;  %2798 = vtanh.f32 %v1139_v45 }
 0x464   :  { %v2789_v51 = vpop.eup %2788  ;;  %4213 = vst [vmem:[#allocation12_spill] sm:$0xff] %v3247_v52 }
 0x465   :  { %v3249_v54 = vmax.f32 %v2789_v51, 0.0  ;;  %v2791_v57 = vpop.eup %2790 }
 0x466   :  { %v3253_v59 = vmax.f32 %v2791_v57, 0.0 }
 0x467   :  { %4214 = vst [vmem:[#allocation13_spill] sm:$0xff] %v3249_v54  ;;  %1190 = vmax.xlane.f32.xlu0 %v3247_v52  ;;  %1192 = vmax.xlane.f32.xlu1 %v3249_v54 }
 0x468   :  { %v2793_v58 = vpop.eup %2792  ;;  %4215 = vst [vmem:[#allocation14_spill] sm:$0xff] %v3253_v59 }
 0x469   :  { %v3255_v60 = vmax.f32 %v2793_v58, 0.0  ;;  %v2795_v61 = vpop.eup %2794 }
 0x46a   :  { %v3259_v63 = vmax.f32 %v2795_v61, 0.0 }
 0x46b   :  { %4216 = vst [vmem:[#allocation15_spill] sm:$0xff] %v3255_v60  ;;  %1194 = vmax.xlane.f32.xlu0 %v3253_v59  ;;  %1196 = vmax.xlane.f32.xlu1 %v3255_v60 }
 0x46c   :  { %v2797_v62 = vpop.eup %2796  ;;  %4217 = vst [vmem:[#allocation16_spill] sm:$0xff] %v3259_v63 }
 0x46d   :  { %v3261_v0 = vmax.f32 %v2797_v62, 0.0  ;;  %v2799_v1 = vpop.eup %2798 }
 0x46e   :  { %v3265_v28 = vmax.f32 %v2799_v1, 0.0 }
 0x46f   :  { %4218 = vst [vmem:[#allocation17_spill] sm:$0xff] %v3261_v0  ;;  %1198 = vmax.xlane.f32.xlu0 %v3259_v63  ;;  %1200 = vmax.xlane.f32.xlu1 %v3261_v0 }
 0x470   :  { %4219 = vst [vmem:[#allocation18_spill] sm:$0xff] %v3265_v28 }
 0x473   :  { %1202 = vmax.xlane.f32.xlu0 %v3265_v28 }
 0x4df   :  { %v1175_v39 = vpop.xlane.xlu1 %1174 }
 0x4e0   :  { %vm1205_vm3 = vcmp.eq.f32.partialorder %v3220_v13, %v1175_v39  ;;  %v1173_v41 = vpop.xlane.xlu0 %1172 }
 0x4e1   :  { %v3270_v53 = vsel %vm1205_vm3, %v2969_v49, 128  ;;  %vm1204_vm4 = vcmp.eq.f32.partialorder %v3222_v15, %v1173_v41 }
 0x4e2   :  { %v3274_v55 = vsel %vm1204_vm4, %v2969_v49, 128  ;;  %v1251_v2 = vshra.s32 %v3270_v53, 16 }
 0x4e3   :  { %v1237_v3 = vshra.s32 %v3274_v55, 16 }
 0x4e4   :  { %v1179_v4 = vpop.xlane.xlu0 %1178  ;;  %v3278_v5 = vcvt.s32.f32 %v1251_v2 }
 0x4e5   :  { %vm1207_vm5 = vcmp.eq.f32.partialorder %v3226_v20, %v1179_v4  ;;  %v3281_v6 = vcvt.s32.f32 %v1237_v3 }
 0x4e6   :  { %v3284_v7 = vsel %vm1207_vm5, %v2969_v49, 128  ;;  %1254 = vmin.xlane.f32.xlu0 %v3278_v5 }
 0x4e7   :  { %1240 = vmin.xlane.f32.xlu1 %v3281_v6  ;;  %v1279_v8 = vshra.s32 %v3284_v7, 16 }
 0x4e8   :  { %v1177_v9 = vpop.xlane.xlu0 %1176  ;;  %v1181_v10 = vpop.xlane.xlu1 %1180 }
 0x4e9   :  { %vm1206_vm6 = vcmp.eq.f32.partialorder %v3229_v30, %v1177_v9  ;;  %vm1208_vm7 = vcmp.eq.f32.partialorder %v3231_v31, %v1181_v10  ;;  %v3291_v11 = vcvt.s32.f32 %v1279_v8 }
 0x4ea   :  { %v3294_v12 = vsel %vm1206_vm6, %v2969_v49, 128  ;;  %v3297_v56 = vsel %vm1208_vm7, %v2969_v49, 128 }
 0x4eb   :  { %1282 = vmin.xlane.f32.xlu0 %v3291_v11  ;;  %v1265_v14 = vshra.s32 %v3294_v12, 16  ;;  %v1293_v21 = vshra.s32 %v3297_v56, 16 }
 0x4ec   :  { %v1183_v16 = vpop.xlane.xlu0 %1182  ;;  %v1185_v17 = vpop.xlane.xlu1 %1184 }
 0x4ed   :  { %vm1209_vm8 = vcmp.eq.f32.partialorder %v3235_v37, %v1183_v16  ;;  %vm1210_vm9 = vcmp.eq.f32.partialorder %v3237_v38, %v1185_v17  ;;  %v3303_v19 = vcvt.s32.f32 %v1265_v14  ;;  %v3319_v18 = vcvt.s32.f32 %v1293_v21 }
 0x4ee   :  { %v3307_v22 = vsel %vm1209_vm8, %v2969_v49, 128  ;;  %v3310_v23 = vsel %vm1210_vm9, %v2969_v49, 128 }
 0x4ef   :  { %1268 = vmin.xlane.f32.xlu1 %v3303_v19  ;;  %v1307_v24 = vshra.s32 %v3307_v22, 16  ;;  %v1321_v27 = vshra.s32 %v3310_v23, 16 }
 0x4f0   :  { %v1187_v25 = vpop.xlane.xlu0 %1186  ;;  %v1189_v26 = vpop.xlane.xlu1 %1188 }
 0x4f1   :  { %vm1211_vm10 = vcmp.eq.f32.partialorder %v3241_v47, %v1187_v25  ;;  %vm1212_vm11 = vcmp.eq.f32.partialorder %v3243_v48, %v1189_v26  ;;  %v3317_v29 = vcvt.s32.f32 %v1307_v24  ;;  %v3330_v40 = vcvt.s32.f32 %v1321_v27 }
 0x4f2   :  { %v3322_v32 = vsel %vm1211_vm10, %v2969_v49, 128  ;;  %v3325_v33 = vsel %vm1212_vm11, %v2969_v49, 128 }
 0x4f3   :  { %1310 = vmin.xlane.f32.xlu0 %v3317_v29  ;;  %1296 = vmin.xlane.f32.xlu1 %v3319_v18  ;;  %v1335_v34 = vshra.s32 %v3322_v32, 16  ;;  %v1349_v43 = vshra.s32 %v3325_v33, 16 }
 0x4f4   :  { %v1191_v35 = vpop.xlane.xlu0 %1190  ;;  %v1193_v36 = vpop.xlane.xlu1 %1192 }
 0x4f5   :  { %vm1213_vm12 = vcmp.eq.f32.partialorder %v3247_v52, %v1191_v35  ;;  %vm1214_vm13 = vcmp.eq.f32.partialorder %v3249_v54, %v1193_v36  ;;  %v3334_v42 = vcvt.s32.f32 %v1335_v34  ;;  %v3351_v61 = vcvt.s32.f32 %v1349_v43 }
 0x4f6   :  { %v3338_v44 = vsel %vm1213_vm12, %v2969_v49, 128  ;;  %v3341_v45 = vsel %vm1214_vm13, %v2969_v49, 128  ;;  %v1250_v35 = vand.u32 65535, %v3270_v53  ;;  %v1236_v36 = vand.u32 65535, %v3274_v55 }
 0x4f7   :  { %1338 = vmin.xlane.f32.xlu0 %v3334_v42  ;;  %1324 = vmin.xlane.f32.xlu1 %v3330_v40  ;;  %v1363_v46 = vshra.s32 %v3338_v44, 16  ;;  %v1377_v57 = vshra.s32 %v3341_v45, 16 }
 0x4f8   :  { %v1195_v50 = vpop.xlane.xlu0 %1194  ;;  %v1197_v51 = vpop.xlane.xlu1 %1196 }
 0x4f9   :  { %vm1215_vm14 = vcmp.eq.f32.partialorder %v3253_v59, %v1195_v50  ;;  %vm1216_vm15 = vcmp.eq.f32.partialorder %v3255_v60, %v1197_v51  ;;  %v3349_v58 = vcvt.s32.f32 %v1363_v46  ;;  %v3362_v3 = vcvt.s32.f32 %v1377_v57 }
 0x4fa   :  { %v3354_v62 = vsel %vm1215_vm14, %v2969_v49, 128  ;;  %v3357_v1 = vsel %vm1216_vm15, %v2969_v49, 128  ;;  %v1252_v46 = vcvt.s32.f32 %v1250_v35  ;;  %v1238_v51 = vcvt.s32.f32 %v1236_v36 }
 0x4fb   :  { %1366 = vmin.xlane.f32.xlu0 %v3349_v58  ;;  %1352 = vmin.xlane.f32.xlu1 %v3351_v61  ;;  %v1391_v39 = vshra.s32 %v3354_v62, 16  ;;  %v1405_v8 = vshra.s32 %v3357_v1, 16  ;;  %v1278_v57 = vand.u32 65535, %v3284_v7  ;;  %v1334_v35 = vand.u32 65535, %v3322_v32 }
 0x4fc   :  { %v1199_v41 = vpop.xlane.xlu0 %1198  ;;  %v1201_v2 = vpop.xlane.xlu1 %1200  ;;  %v1320_v36 = vand.u32 65535, %v3310_v23  ;;  %v1362_v32 = vand.u32 65535, %v3338_v44  ;;  %v1348_v23 = vand.u32 65535, %v3325_v33  ;;  %v1390_v44 = vand.u32 65535, %v3354_v62 }
 0x4fd   :  { %vm1217_vm1 = vcmp.eq.f32.partialorder %v3259_v63, %v1199_v41  ;;  %vm1218_vm2 = vcmp.eq.f32.partialorder %v3261_v0, %v1201_v2  ;;  %v3366_v4 = vcvt.s32.f32 %v1391_v39  ;;  %v3381_v21 = vcvt.s32.f32 %v1405_v8 }
 0x4fe   :  { %v3370_v9 = vsel %vm1217_vm1, %v2969_v49, 128  ;;  %v3373_v10 = vsel %vm1218_vm2, %v2969_v49, 128  ;;  %v1280_v55 = vcvt.s32.f32 %v1278_v57  ;;  %v1264_v2 = vand.u32 65535, %v3294_v12 }
 0x4ff   :  { %1394 = vmin.xlane.f32.xlu0 %v3366_v4  ;;  %1380 = vmin.xlane.f32.xlu1 %v3362_v3  ;;  %v1419_v14 = vshra.s32 %v3370_v9, 16  ;;  %v1433_v24 = vshra.s32 %v3373_v10, 16  ;;  %v1322_v57 = vcvt.s32.f32 %v1320_v36  ;;  %v1376_v33 = vand.u32 65535, %v3341_v45 }
 0x500   :  { %v1203_v16 = vpop.xlane.xlu0 %1202  ;;  %v1266_v7 = vcvt.s32.f32 %v1264_v2  ;;  %v1350_v2 = vcvt.s32.f32 %v1348_v23  ;;  %v1418_v62 = vand.u32 65535, %v3370_v9  ;;  %v1404_v45 = vand.u32 65535, %v3357_v1 }
 0x501   :  { %vm1219_vm0 = vcmp.eq.f32.partialorder %v3265_v28, %v1203_v16  ;;  %v3379_v17 = vcvt.s32.f32 %v1419_v14  ;;  %v3392_v34 = vcvt.s32.f32 %v1433_v24  ;;  %v1306_v14 = vand.u32 65535, %v3307_v22 }
 0x502   :  { %v3385_v25 = vsel %vm1219_vm0, %v2969_v49, 128  ;;  %v1432_v1 = vand.u32 65535, %v3373_v10 }
 0x503   :  { %1422 = vmin.xlane.f32.xlu0 %v3379_v17  ;;  %1408 = vmin.xlane.f32.xlu1 %v3381_v21  ;;  %v1447_v26 = vshra.s32 %v3385_v25, 16  ;;  %v1446_v9 = vand.u32 65535, %v3385_v25 }
 0x505   :  { %v3390_v27 = vcvt.s32.f32 %v1447_v26  ;;  %v1308_v26 = vcvt.s32.f32 %v1306_v14  ;;  %v1392_v14 = vcvt.s32.f32 %v1390_v44 }
 0x507   :  { %1450 = vmin.xlane.f32.xlu0 %v3390_v27  ;;  %1436 = vmin.xlane.f32.xlu1 %v3392_v34 }
 0x573   :  { %v3398_v43 = vpop.xlane.xlu0 %1254 }
 0x574   :  { %v3400_v50 = vpop.xlane.xlu1 %1240  ;;  %vm1256_vm3 = vcmp.eq.f32.partialorder %v3278_v5, %v3398_v43 }
 0x575   :  { %v1257_v39 = vsel %vm1256_vm3, %v1252_v46, inf  ;;  %vm1242_vm4 = vcmp.eq.f32.partialorder %v3281_v6, %v3400_v50  ;;  %v1292_v6 = vand.u32 65535, %v3297_v56  ;;  %v1247_v25 = vcvt.f32.s32 %v3400_v50 }
 0x576   :  { %1258 = vmin.xlane.f32.xlu0 %v1257_v39  ;;  %v1243_v41 = vsel %vm1242_vm4, %v1238_v51, inf  ;;  %v1336_v51 = vcvt.s32.f32 %v1334_v35  ;;  %v1406_v35 = vcvt.s32.f32 %v1404_v45 }
 0x577   :  { %1244 = vmin.xlane.f32.xlu1 %v1243_v41 }
 0x578   :  { %v3407_v53 = vpop.xlane.xlu0 %1282 }
 0x579   :  { %vm1284_vm5 = vcmp.eq.f32.partialorder %v3291_v11, %v3407_v53  ;;  %v1294_v11 = vcvt.s32.f32 %v1292_v6  ;;  %v1378_v6 = vcvt.s32.f32 %v1376_v33  ;;  %v1289_v23 = vcvt.f32.s32 %v3407_v53 }
 0x57a   :  { %v1285_v8 = vsel %vm1284_vm5, %v1280_v55, inf  ;;  %v1364_v55 = vcvt.s32.f32 %v1362_v32 }
 0x57b   :  { %1286 = vmin.xlane.f32.xlu0 %v1285_v8  ;;  %v1290_v33 = vshll.u32 %v1289_v23, 16 }
 0x57c   :  { %v3412_v5 = vpop.xlane.xlu1 %1268 }
 0x57d   :  { %vm1270_vm6 = vcmp.eq.f32.partialorder %v3303_v19, %v3412_v5 }
 0x57e   :  { %v1271_v16 = vsel %vm1270_vm6, %v1266_v7, inf }
 0x57f   :  { %1272 = vmin.xlane.f32.xlu1 %v1271_v16 }
 0x580   :  { %v3418_v24 = vpop.xlane.xlu0 %1310  ;;  %v3420_v12 = vpop.xlane.xlu1 %1296 }
 0x581   :  { %vm1312_vm7 = vcmp.eq.f32.partialorder %v3317_v29, %v3418_v24  ;;  %vm1298_vm8 = vcmp.eq.f32.partialorder %v3319_v18, %v3420_v12 }
 0x582   :  { %v1313_v56 = vsel %vm1312_vm7, %v1308_v26, inf  ;;  %v1299_v19 = vsel %vm1298_vm8, %v1294_v11, inf  ;;  %v1420_v11 = vcvt.s32.f32 %v1418_v62 }
 0x583   :  { %1314 = vmin.xlane.f32.xlu0 %v1313_v56  ;;  %1300 = vmin.xlane.f32.xlu1 %v1299_v19  ;;  %v1448_v19 = vcvt.s32.f32 %v1446_v9 }
 0x584   :  { %v3428_v22 = vpop.xlane.xlu0 %1338  ;;  %v3430_v46 = vpop.xlane.xlu1 %1324 }
 0x585   :  { %vm1340_vm9 = vcmp.eq.f32.partialorder %v3334_v42, %v3428_v22  ;;  %vm1326_vm10 = vcmp.eq.f32.partialorder %v3330_v40, %v3430_v46  ;;  %v1331_v9 = vcvt.f32.s32 %v3430_v46 }
 0x586   :  { %v1341_v29 = vsel %vm1340_vm9, %v1336_v51, inf  ;;  %v1327_v18 = vsel %vm1326_vm10, %v1322_v57, inf  ;;  %v1434_v51 = vcvt.s32.f32 %v1432_v1 }
 0x587   :  { %1342 = vmin.xlane.f32.xlu0 %v1341_v29  ;;  %1328 = vmin.xlane.f32.xlu1 %v1327_v18 }
 0x588   :  { %v3438_v39 = vpop.xlane.xlu0 %1366  ;;  %v3440_v41 = vpop.xlane.xlu1 %1352 }
 0x589   :  { %vm1368_vm11 = vcmp.eq.f32.partialorder %v3349_v58, %v3438_v39  ;;  %vm1354_vm12 = vcmp.eq.f32.partialorder %v3351_v61, %v3440_v41  ;;  %v1359_v46 = vcvt.f32.s32 %v3440_v41 }
 0x58a   :  { %v1369_v40 = vsel %vm1368_vm11, %v1364_v55, inf  ;;  %v1355_v42 = vsel %vm1354_vm12, %v1350_v2, inf  ;;  %v1248_v55 = vshll.u32 %v1247_v25, 16 }
 0x58b   :  { %1370 = vmin.xlane.f32.xlu0 %v1369_v40  ;;  %1356 = vmin.xlane.f32.xlu1 %v1355_v42  ;;  %v1275_v40 = vcvt.f32.s32 %v3412_v5  ;;  %v1303_v5 = vcvt.f32.s32 %v3420_v12  ;;  %v1360_v41 = vshll.u32 %v1359_v46, 16 }
 0x58c   :  { %v3448_v8 = vpop.xlane.xlu0 %1394  ;;  %v3450_v7 = vpop.xlane.xlu1 %1380 }
 0x58d   :  { %vm1396_vm13 = vcmp.eq.f32.partialorder %v3366_v4, %v3448_v8  ;;  %vm1382_vm14 = vcmp.eq.f32.partialorder %v3362_v3, %v3450_v7  ;;  %v1276_v62 = vshll.u32 %v1275_v40, 16 }
 0x58e   :  { %v1397_v58 = vsel %vm1396_vm13, %v1392_v14, inf  ;;  %v1383_v61 = vsel %vm1382_vm14, %v1378_v6, inf  ;;  %v1317_v14 = vcvt.f32.s32 %v3418_v24 }
 0x58f   :  { %1398 = vmin.xlane.f32.xlu0 %v1397_v58  ;;  %1384 = vmin.xlane.f32.xlu1 %v1383_v61 }
 0x590   :  { %v3458_v16 = vpop.xlane.xlu0 %1422  ;;  %v3460_v26 = vpop.xlane.xlu1 %1408 }
 0x591   :  { %vm1424_vm15 = vcmp.eq.f32.partialorder %v3379_v17, %v3458_v16  ;;  %vm1410_vm1 = vcmp.eq.f32.partialorder %v3381_v21, %v3460_v26  ;;  %v1261_v21 = vcvt.f32.s32 %v3398_v43 }
 0x592   :  { %v1425_v3 = vsel %vm1424_vm15, %v1420_v11, inf  ;;  %v1411_v4 = vsel %vm1410_vm1, %v1406_v35, inf  ;;  %v1318_v11 = vshll.u32 %v1317_v14, 16  ;;  %v1345_v35 = vcvt.f32.s32 %v3428_v22 }
 0x593   :  { %1426 = vmin.xlane.f32.xlu0 %v1425_v3  ;;  %1412 = vmin.xlane.f32.xlu1 %v1411_v4  ;;  %v1262_v32 = vshll.u32 %v1261_v21, 16  ;;  %v1304_v3 = vshll.u32 %v1303_v5, 16  ;;  %v1332_v21 = vshll.u32 %v1331_v9, 16  ;;  %v1373_v22 = vcvt.f32.s32 %v3438_v39 }
 0x594   :  { %v3468_v36 = vpop.xlane.xlu0 %1450  ;;  %v3470_v56 = vpop.xlane.xlu1 %1436  ;;  %v1429_v5 = vcvt.f32.s32 %v3458_v16 }
 0x595   :  { %vm1452_vm2 = vcmp.eq.f32.partialorder %v3390_v27, %v3468_v36  ;;  %vm1438_vm0 = vcmp.eq.f32.partialorder %v3392_v34, %v3470_v56  ;;  %v1374_v39 = vshll.u32 %v1373_v22, 16 }
 0x596   :  { %v1453_v10 = vsel %vm1452_vm2, %v1448_v19, inf  ;;  %v1439_v17 = vsel %vm1438_vm0, %v1434_v51, inf  ;;  %v1430_v16 = vshll.u32 %v1429_v5, 16 }
 0x597   :  { %1454 = vmin.xlane.f32.xlu0 %v1453_v10  ;;  %1440 = vmin.xlane.f32.xlu1 %v1439_v17  ;;  %v1346_v17 = vshll.u32 %v1345_v35, 16 }
 0x603   :  { %v1259_v57 = vpop.xlane.xlu0 %1258 }
 0x604   :  { %v1260_v29 = vcvt.f32.s32 %v1259_v57  ;;  %v1245_v18 = vpop.xlane.xlu1 %1244 }
 0x605   :  { %v1246_v2 = vcvt.f32.s32 %v1245_v18 }
 0x606   :  { %v1263_v27 = vadd.s32 %v1262_v32, %v1260_v29 }
 0x607   :  { %v1249_v44 = vadd.s32 %v1248_v55, %v1246_v2 }
 0x608   :  { %v1287_v34 = vpop.xlane.xlu0 %1286  ;;  %vm1461_vm3 = vcmp.eq.s32.totalorder %v2969_v49, %v1263_v27  ;;  %v1401_v27 = vcvt.f32.s32 %v3448_v8 }
 0x609   :  { %v1288_v42 = vcvt.f32.s32 %v1287_v34  ;;  %v3482_v43 = vsel %vm1461_vm3, -1.0, %v3220_v13  ;;  %vm1460_vm4 = vcmp.eq.s32.totalorder %v2969_v49, %v1249_v44  ;;  %v1387_v44 = vcvt.f32.s32 %v3450_v7 }
 0x60a   :  { %1494 = vmax.xlane.f32.xlu0 %v3482_v43  ;;  %v3487_v50 = vsel %vm1460_vm4, -1.0, %v3222_v15  ;;  %v1402_v8 = vshll.u32 %v1401_v27, 16 }
 0x60b   :  { %v1291_v53 = vadd.s32 %v1290_v33, %v1288_v42  ;;  %1492 = vmax.xlane.f32.xlu1 %v3487_v50  ;;  %v1388_v7 = vshll.u32 %v1387_v44, 16 }
 0x60c   :  { %v1273_v6 = vpop.xlane.xlu1 %1272 }
 0x60d   :  { %v1274_v45 = vcvt.f32.s32 %v1273_v6  ;;  %vm1463_vm5 = vcmp.eq.s32.totalorder %v2969_v49, %v1291_v53 }
 0x60e   :  { %v3494_v58 = vsel %vm1463_vm5, -1.0, %v3226_v20 }
 0x60f   :  { %v1277_v61 = vadd.s32 %v1276_v62, %v1274_v45  ;;  %1498 = vmax.xlane.f32.xlu0 %v3494_v58  ;;  %v1415_v45 = vcvt.f32.s32 %v3460_v26 }
 0x610   :  { %v1315_v1 = vpop.xlane.xlu0 %1314  ;;  %v1301_v24 = vpop.xlane.xlu1 %1300 }
 0x611   :  { %v1316_v4 = vcvt.f32.s32 %v1315_v1  ;;  %v1302_v19 = vcvt.f32.s32 %v1301_v24  ;;  %vm1462_vm6 = vcmp.eq.s32.totalorder %v2969_v49, %v1277_v61  ;;  %v1416_v26 = vshll.u32 %v1415_v45, 16 }
 0x612   :  { %v3501_v12 = vsel %vm1462_vm6, -1.0, %v3229_v30 }
 0x613   :  { %v1319_v51 = vadd.s32 %v1318_v11, %v1316_v4  ;;  %v1305_v10 = vadd.s32 %v1304_v3, %v1302_v19  ;;  %1496 = vmax.xlane.f32.xlu1 %v3501_v12  ;;  %v1457_v19 = vcvt.f32.s32 %v3468_v36 }
 0x614   :  { %v1343_v25 = vpop.xlane.xlu0 %1342  ;;  %v1329_v57 = vpop.xlane.xlu1 %1328 }
 0x615   :  { %v1344_v32 = vcvt.f32.s32 %v1343_v25  ;;  %v1330_v23 = vcvt.f32.s32 %v1329_v57  ;;  %vm1465_vm7 = vcmp.eq.s32.totalorder %v2969_v49, %v1319_v51  ;;  %vm1464_vm8 = vcmp.eq.s32.totalorder %v2969_v49, %v1305_v10 }
 0x616   :  { %v3509_v29 = vsel %vm1465_vm7, -1.0, %v3235_v37  ;;  %v3512_v18 = vsel %vm1464_vm8, -1.0, %v3231_v31  ;;  %v1443_v51 = vcvt.f32.s32 %v3470_v56  ;;  %v1458_v36 = vshll.u32 %v1457_v19, 16 }
 0x617   :  { %v1347_v55 = vadd.s32 %v1346_v17, %v1344_v32  ;;  %v1333_v2 = vadd.s32 %v1332_v21, %v1330_v23  ;;  %1502 = vmax.xlane.f32.xlu0 %v3509_v29  ;;  %1500 = vmax.xlane.f32.xlu1 %v3512_v18 }
 0x618   :  { %v1371_v33 = vpop.xlane.xlu0 %1370  ;;  %v1357_v34 = vpop.xlane.xlu1 %1356  ;;  %v1444_v56 = vshll.u32 %v1443_v51, 16 }
 0x619   :  { %v1372_v40 = vcvt.f32.s32 %v1371_v33  ;;  %v1358_v42 = vcvt.f32.s32 %v1357_v34  ;;  %vm1467_vm9 = vcmp.eq.s32.totalorder %v2969_v49, %v1347_v55  ;;  %vm1466_vm10 = vcmp.eq.s32.totalorder %v2969_v49, %v1333_v2 }
 0x61a   :  { %v3521_v53 = vsel %vm1467_vm9, -1.0, %v3241_v47  ;;  %v3524_v14 = vsel %vm1466_vm10, -1.0, %v3237_v38 }
 0x61b   :  { %v1375_v6 = vadd.s32 %v1374_v39, %v1372_v40  ;;  %v1361_v62 = vadd.s32 %v1360_v41, %v1358_v42  ;;  %1506 = vmax.xlane.f32.xlu0 %v3521_v53  ;;  %1504 = vmax.xlane.f32.xlu1 %v3524_v14 }
 0x61c   :  { %v1399_v61 = vpop.xlane.xlu0 %1398  ;;  %v1385_v11 = vpop.xlane.xlu1 %1384 }
 0x61d   :  { %v1400_v35 = vcvt.f32.s32 %v1399_v61  ;;  %v1386_v9 = vcvt.f32.s32 %v1385_v11  ;;  %vm1469_vm11 = vcmp.eq.s32.totalorder %v2969_v49, %v1375_v6  ;;  %vm1468_vm12 = vcmp.eq.s32.totalorder %v2969_v49, %v1361_v62 }
 0x61e   :  { %v3533_v1 = vsel %vm1469_vm11, -1.0, %v3247_v52  ;;  %v3536_v24 = vsel %vm1468_vm12, -1.0, %v3243_v48 }
 0x61f   :  { %v1403_v3 = vadd.s32 %v1402_v8, %v1400_v35  ;;  %v1389_v4 = vadd.s32 %v1388_v7, %v1386_v9  ;;  %1510 = vmax.xlane.f32.xlu0 %v3533_v1  ;;  %1508 = vmax.xlane.f32.xlu1 %v3536_v24 }
 0x620   :  { %v1427_v10 = vpop.xlane.xlu0 %1426  ;;  %v1413_v17 = vpop.xlane.xlu1 %1412 }
 0x621   :  { %v1428_v21 = vcvt.f32.s32 %v1427_v10  ;;  %v1414_v22 = vcvt.f32.s32 %v1413_v17  ;;  %vm1471_vm13 = vcmp.eq.s32.totalorder %v2969_v49, %v1403_v3  ;;  %vm1470_vm14 = vcmp.eq.s32.totalorder %v2969_v49, %v1389_v4 }
 0x622   :  { %v3545_v46 = vsel %vm1471_vm13, -1.0, %v3253_v59  ;;  %v3548_v25 = vsel %vm1470_vm14, -1.0, %v3249_v54 }
 0x623   :  { %v1431_v57 = vadd.s32 %v1430_v16, %v1428_v21  ;;  %v1417_v32 = vadd.s32 %v1416_v26, %v1414_v22  ;;  %1514 = vmax.xlane.f32.xlu0 %v3545_v46  ;;  %1512 = vmax.xlane.f32.xlu1 %v3548_v25 }
 0x624   :  { %v1455_v23 = vpop.xlane.xlu0 %1454  ;;  %v1441_v55 = vpop.xlane.xlu1 %1440 }
 0x625   :  { %v1456_v2 = vcvt.f32.s32 %v1455_v23  ;;  %v1442_v39 = vcvt.f32.s32 %v1441_v55  ;;  %vm1473_vm15 = vcmp.eq.s32.totalorder %v2969_v49, %v1431_v57  ;;  %vm1472_vm1 = vcmp.eq.s32.totalorder %v2969_v49, %v1417_v32 }
 0x626   :  { %v3555_v41 = vsel %vm1473_vm15, -1.0, %v3259_v63  ;;  %v3558_v27 = vsel %vm1472_vm1, -1.0, %v3255_v60 }
 0x627   :  { %v1459_v44 = vadd.s32 %v1458_v36, %v1456_v2  ;;  %v1445_v33 = vadd.s32 %v1444_v56, %v1442_v39  ;;  %1518 = vmax.xlane.f32.xlu0 %v3555_v41  ;;  %1516 = vmax.xlane.f32.xlu1 %v3558_v27 }
 0x629   :  { %vm1475_vm2 = vcmp.eq.s32.totalorder %v2969_v49, %v1459_v44  ;;  %vm1474_vm0 = vcmp.eq.s32.totalorder %v2969_v49, %v1445_v33 }
 0x62a   :  { %v3565_v34 = vsel %vm1475_vm2, -1.0, %v3265_v28  ;;  %v3568_v40 = vsel %vm1474_vm0, -1.0, %v3261_v0 }
 0x62b   :  { %1522 = vmax.xlane.f32.xlu0 %v3565_v34  ;;  %1520 = vmax.xlane.f32.xlu1 %v3568_v40 }
 0x697   :  { %v1495_v42 = vpop.xlane.xlu0 %1494 }
 0x698   :  { %vm1525_vm3 = vcmp.eq.f32.partialorder %v3482_v43, %v1495_v42  ;;  %v1493_v6 = vpop.xlane.xlu1 %1492 }
 0x699   :  { %v3574_v62 = vsel %vm1525_vm3, %v2969_v49, 128  ;;  %vm1524_vm4 = vcmp.eq.f32.partialorder %v3487_v50, %v1493_v6 }
 0x69a   :  { %v3578_v8 = vsel %vm1524_vm4, %v2969_v49, 128  ;;  %v1571_v7 = vshra.s32 %v3574_v62, 16 }
 0x69b   :  { %v1557_v5 = vshra.s32 %v3578_v8, 16 }
 0x69c   :  { %v1499_v45 = vpop.xlane.xlu0 %1498  ;;  %v3582_v61 = vcvt.s32.f32 %v1571_v7 }
 0x69d   :  { %vm1527_vm5 = vcmp.eq.f32.partialorder %v3494_v58, %v1499_v45  ;;  %v3585_v11 = vcvt.s32.f32 %v1557_v5 }
 0x69e   :  { %v3588_v35 = vsel %vm1527_vm5, %v2969_v49, 128  ;;  %1574 = vmin.xlane.f32.xlu0 %v3582_v61 }
 0x69f   :  { %1560 = vmin.xlane.f32.xlu1 %v3585_v11  ;;  %v1599_v9 = vshra.s32 %v3588_v35, 16  ;;  %v1598_v52 = vand.u32 65535, %v3588_v35 }
 0x6a0   :  { %v1497_v3 = vpop.xlane.xlu1 %1496 }
 0x6a1   :  { %vm1526_vm6 = vcmp.eq.f32.partialorder %v3501_v12, %v1497_v3  ;;  %v3594_v4 = vcvt.s32.f32 %v1599_v9 }
 0x6a2   :  { %v3597_v16 = vsel %vm1526_vm6, %v2969_v49, 128 }
 0x6a3   :  { %1602 = vmin.xlane.f32.xlu0 %v3594_v4  ;;  %v1585_v26 = vshra.s32 %v3597_v16, 16 }
 0x6a4   :  { %v1503_v19 = vpop.xlane.xlu0 %1502  ;;  %v1501_v51 = vpop.xlane.xlu1 %1500 }
 0x6a5   :  { %vm1529_vm7 = vcmp.eq.f32.partialorder %v3509_v29, %v1503_v19  ;;  %vm1528_vm8 = vcmp.eq.f32.partialorder %v3512_v18, %v1501_v51  ;;  %v3603_v10 = vcvt.s32.f32 %v1585_v26 }
 0x6a6   :  { %v3606_v17 = vsel %vm1529_vm7, %v2969_v49, 128  ;;  %v3609_v21 = vsel %vm1528_vm8, %v2969_v49, 128 }
 0x6a7   :  { %1588 = vmin.xlane.f32.xlu1 %v3603_v10  ;;  %v1627_v22 = vshra.s32 %v3606_v17, 16  ;;  %v1613_v57 = vshra.s32 %v3609_v21, 16 }
 0x6a8   :  { %v1507_v32 = vpop.xlane.xlu0 %1506  ;;  %v1505_v36 = vpop.xlane.xlu1 %1504 }
 0x6a9   :  { %vm1531_vm9 = vcmp.eq.f32.partialorder %v3521_v53, %v1507_v32  ;;  %vm1530_vm10 = vcmp.eq.f32.partialorder %v3524_v14, %v1505_v36  ;;  %v3616_v56 = vcvt.s32.f32 %v1627_v22  ;;  %v3618_v23 = vcvt.s32.f32 %v1613_v57 }
 0x6aa   :  { %v3621_v55 = vsel %vm1531_vm9, %v2969_v49, 128  ;;  %v3624_v2 = vsel %vm1530_vm10, %v2969_v49, 128 }
 0x6ab   :  { %1630 = vmin.xlane.f32.xlu0 %v3616_v56  ;;  %1616 = vmin.xlane.f32.xlu1 %v3618_v23  ;;  %v1655_v39 = vshra.s32 %v3621_v55, 16  ;;  %v1641_v44 = vshra.s32 %v3624_v2, 16 }
 0x6ac   :  { %v1511_v33 = vpop.xlane.xlu0 %1510  ;;  %v1509_v42 = vpop.xlane.xlu1 %1508 }
 0x6ad   :  { %vm1533_vm11 = vcmp.eq.f32.partialorder %v3533_v1, %v1511_v33  ;;  %vm1532_vm12 = vcmp.eq.f32.partialorder %v3536_v24, %v1509_v42  ;;  %v3632_v6 = vcvt.s32.f32 %v1655_v39  ;;  %v3634_v7 = vcvt.s32.f32 %v1641_v44 }
 0x6ae   :  { %v3637_v5 = vsel %vm1533_vm11, %v2969_v49, 128  ;;  %v3640_v45 = vsel %vm1532_vm12, %v2969_v49, 128 }
 0x6af   :  { %v1683_v9 = vshra.s32 %v3637_v5, 16  ;;  %1658 = vmin.xlane.f32.xlu0 %v3632_v6  ;;  %1644 = vmin.xlane.f32.xlu1 %v3634_v7  ;;  %v1669_v3 = vshra.s32 %v3640_v45, 16 }
 0x6b0   :  { %v1515_v26 = vpop.xlane.xlu0 %1514  ;;  %v1513_v19 = vpop.xlane.xlu1 %1512 }
 0x6b1   :  { %vm1535_vm13 = vcmp.eq.f32.partialorder %v3545_v46, %v1515_v26  ;;  %vm1534_vm14 = vcmp.eq.f32.partialorder %v3548_v25, %v1513_v19  ;;  %v3648_v51 = vcvt.s32.f32 %v1683_v9  ;;  %v3650_v22 = vcvt.s32.f32 %v1669_v3 }
 0x6b2   :  { %v3653_v57 = vsel %vm1535_vm13, %v2969_v49, 128  ;;  %v3656_v32 = vsel %vm1534_vm14, %v2969_v49, 128 }
 0x6b3   :  { %v1711_v36 = vshra.s32 %v3653_v57, 16  ;;  %1686 = vmin.xlane.f32.xlu0 %v3648_v51  ;;  %1672 = vmin.xlane.f32.xlu1 %v3650_v22  ;;  %v1697_v39 = vshra.s32 %v3656_v32, 16 }
 0x6b4   :  { %v1519_v44 = vpop.xlane.xlu0 %1518  ;;  %v1517_v33 = vpop.xlane.xlu1 %1516 }
 0x6b5   :  { %vm1537_vm15 = vcmp.eq.f32.partialorder %v3555_v41, %v1519_v44  ;;  %vm1536_vm1 = vcmp.eq.f32.partialorder %v3558_v27, %v1517_v33  ;;  %v3664_v42 = vcvt.s32.f32 %v1711_v36  ;;  %v3666_v9 = vcvt.s32.f32 %v1697_v39 }
 0x6b6   :  { %v3669_v3 = vsel %vm1537_vm15, %v2969_v49, 128  ;;  %v3672_v26 = vsel %vm1536_vm1, %v2969_v49, 128 }
 0x6b7   :  { %v1739_v19 = vshra.s32 %v3669_v3, 16  ;;  %v1725_v0 = vshra.s32 %v3672_v26, 16  ;;  %1714 = vmin.xlane.f32.xlu0 %v3664_v42  ;;  %1700 = vmin.xlane.f32.xlu1 %v3666_v9 }
 0x6b8   :  { %v1523_v44 = vpop.xlane.xlu0 %1522  ;;  %v1521_v33 = vpop.xlane.xlu1 %1520 }
 0x6b9   :  { %vm1539_vm2 = vcmp.eq.f32.partialorder %v3565_v34, %v1523_v44  ;;  %vm1538_vm0 = vcmp.eq.f32.partialorder %v3568_v40, %v1521_v33  ;;  %v3680_v36 = vcvt.s32.f32 %v1739_v19  ;;  %v3682_v39 = vcvt.s32.f32 %v1725_v0 }
 0x6ba   :  { %v3685_v28 = vsel %vm1539_vm2, %v2969_v49, 128  ;;  %v3688_v60 = vsel %vm1538_vm0, %v2969_v49, 128  ;;  %v1570_v0 = vand.u32 65535, %v3574_v62  ;;  %v1556_v33 = vand.u32 65535, %v3578_v8 }
 0x6bb   :  { %v1767_v63 = vshra.s32 %v3685_v28, 16  ;;  %v1753_v54 = vshra.s32 %v3688_v60, 16  ;;  %1742 = vmin.xlane.f32.xlu0 %v3680_v36  ;;  %1728 = vmin.xlane.f32.xlu1 %v3682_v39  ;;  %v1584_v62 = vand.u32 65535, %v3597_v16 }
 0x6bc   :  { %v1572_v48 = vcvt.s32.f32 %v1570_v0  ;;  %v1600_v0 = vcvt.s32.f32 %v1598_v52  ;;  %v1640_v52 = vand.u32 65535, %v3624_v2  ;;  %v1668_v2 = vand.u32 65535, %v3640_v45 }
 0x6bd   :  { %v3694_v44 = vcvt.s32.f32 %v1767_v63  ;;  %v3696_v19 = vcvt.s32.f32 %v1753_v54  ;;  %v1558_v54 = vcvt.s32.f32 %v1556_v33  ;;  %v1612_v33 = vand.u32 65535, %v3609_v21 }
 0x6be   :  { %v1696_v45 = vand.u32 65535, %v3656_v32  ;;  %v1724_v32 = vand.u32 65535, %v3672_v26  ;;  %v1752_v26 = vand.u32 65535, %v3688_v60 }
 0x6bf   :  { %1770 = vmin.xlane.f32.xlu0 %v3694_v44  ;;  %1756 = vmin.xlane.f32.xlu1 %v3696_v19 }
 0x72b   :  { %v3702_v59 = vpop.xlane.xlu0 %1574 }
 0x72c   :  { %vm1576_vm3 = vcmp.eq.f32.partialorder %v3582_v61, %v3702_v59  ;;  %v3707_v63 = vpop.xlane.xlu1 %1560  ;;  %v1626_v61 = vand.u32 65535, %v3606_v17  ;;  %v1614_v17 = vcvt.s32.f32 %v1612_v33 }
 0x72d   :  { %vm1562_vm4 = vcmp.eq.f32.partialorder %v3585_v11, %v3707_v63  ;;  %v1577_v38 = vsel %vm1576_vm3, %v1572_v48, inf  ;;  %v1586_v48 = vcvt.s32.f32 %v1584_v62 }
 0x72e   :  { %1578 = vmin.xlane.f32.xlu0 %v1577_v38  ;;  %v1563_v47 = vsel %vm1562_vm4, %v1558_v54, inf  ;;  %v1628_v16 = vcvt.s32.f32 %v1626_v61 }
 0x72f   :  { %1564 = vmin.xlane.f32.xlu1 %v1563_v47  ;;  %v1654_v47 = vand.u32 65535, %v3621_v55  ;;  %v1682_v55 = vand.u32 65535, %v3637_v5  ;;  %v1710_v5 = vand.u32 65535, %v3653_v57  ;;  %v1738_v57 = vand.u32 65535, %v3669_v3 }
 0x730   :  { %v3712_v8 = vpop.xlane.xlu0 %1602  ;;  %v1766_v3 = vand.u32 65535, %v3685_v28  ;;  %v1754_v28 = vcvt.s32.f32 %v1752_v26 }
 0x731   :  { %vm1604_vm5 = vcmp.eq.f32.partialorder %v3594_v4, %v3712_v8 }
 0x732   :  { %v1605_v35 = vsel %vm1604_vm5, %v1600_v0, inf  ;;  %v1656_v0 = vcvt.s32.f32 %v1654_v47 }
 0x733   :  { %1606 = vmin.xlane.f32.xlu0 %v1605_v35  ;;  %v1642_v35 = vcvt.s32.f32 %v1640_v52 }
 0x734   :  { %v3718_v31 = vpop.xlane.xlu1 %1588 }
 0x735   :  { %vm1590_vm6 = vcmp.eq.f32.partialorder %v3603_v10, %v3718_v31 }
 0x736   :  { %v1591_v38 = vsel %vm1590_vm6, %v1586_v48, inf  ;;  %v1684_v48 = vcvt.s32.f32 %v1682_v55  ;;  %v1740_v55 = vcvt.s32.f32 %v1738_v57 }
 0x737   :  { %1592 = vmin.xlane.f32.xlu1 %v1591_v38  ;;  %v1670_v38 = vcvt.s32.f32 %v1668_v2  ;;  %v1726_v2 = vcvt.s32.f32 %v1724_v32 }
 0x738   :  { %v3724_v11 = vpop.xlane.xlu0 %1630  ;;  %v3726_v4 = vpop.xlane.xlu1 %1616 }
 0x739   :  { %vm1632_vm7 = vcmp.eq.f32.partialorder %v3616_v56, %v3724_v11  ;;  %vm1618_vm8 = vcmp.eq.f32.partialorder %v3618_v23, %v3726_v4 }
 0x73a   :  { %v1633_v21 = vsel %vm1632_vm7, %v1628_v16, inf  ;;  %v1619_v10 = vsel %vm1618_vm8, %v1614_v17, inf  ;;  %v1712_v16 = vcvt.s32.f32 %v1710_v5  ;;  %v1698_v17 = vcvt.s32.f32 %v1696_v45 }
 0x73b   :  { %1634 = vmin.xlane.f32.xlu0 %v1633_v21  ;;  %1620 = vmin.xlane.f32.xlu1 %v1619_v10 }
 0x73c   :  { %v3734_v54 = vpop.xlane.xlu0 %1658  ;;  %v3736_v62 = vpop.xlane.xlu1 %1644 }
 0x73d   :  { %vm1660_vm9 = vcmp.eq.f32.partialorder %v3632_v6, %v3734_v54  ;;  %vm1646_vm10 = vcmp.eq.f32.partialorder %v3634_v7, %v3736_v62 }
 0x73e   :  { %v1661_v56 = vsel %vm1660_vm9, %v1656_v0, inf  ;;  %v1647_v23 = vsel %vm1646_vm10, %v1642_v35, inf  ;;  %v1768_v0 = vcvt.s32.f32 %v1766_v3 }
 0x73f   :  { %1662 = vmin.xlane.f32.xlu0 %v1661_v56  ;;  %1648 = vmin.xlane.f32.xlu1 %v1647_v23  ;;  %v1567_v23 = vcvt.f32.s32 %v3707_v63 }
 0x740   :  { %v3744_v61 = vpop.xlane.xlu0 %1686  ;;  %v3746_v33 = vpop.xlane.xlu1 %1672 }
 0x741   :  { %vm1688_vm11 = vcmp.eq.f32.partialorder %v3648_v51, %v3744_v61  ;;  %vm1674_vm12 = vcmp.eq.f32.partialorder %v3650_v22, %v3746_v33 }
 0x742   :  { %v1689_v6 = vsel %vm1688_vm11, %v1684_v48, inf  ;;  %v1675_v7 = vsel %vm1674_vm12, %v1670_v38, inf  ;;  %v1609_v48 = vcvt.f32.s32 %v3712_v8 }
 0x743   :  { %1690 = vmin.xlane.f32.xlu0 %v1689_v6  ;;  %1676 = vmin.xlane.f32.xlu1 %v1675_v7  ;;  %v1568_v7 = vshll.u32 %v1567_v23, 16 }
 0x744   :  { %v3754_v47 = vpop.xlane.xlu0 %1714  ;;  %v3756_v52 = vpop.xlane.xlu1 %1700 }
 0x745   :  { %vm1716_vm13 = vcmp.eq.f32.partialorder %v3664_v42, %v3754_v47  ;;  %vm1702_vm14 = vcmp.eq.f32.partialorder %v3666_v9, %v3756_v52 }
 0x746   :  { %v1717_v51 = vsel %vm1716_vm13, %v1712_v16, inf  ;;  %v1703_v22 = vsel %vm1702_vm14, %v1698_v17, inf  ;;  %v1610_v16 = vshll.u32 %v1609_v48, 16  ;;  %v1595_v17 = vcvt.f32.s32 %v3718_v31 }
 0x747   :  { %1718 = vmin.xlane.f32.xlu0 %v1717_v51  ;;  %1704 = vmin.xlane.f32.xlu1 %v1703_v22  ;;  %v1637_v22 = vcvt.f32.s32 %v3724_v11  ;;  %v1623_v31 = vcvt.f32.s32 %v3726_v4 }
 0x748   :  { %v3764_v21 = vpop.xlane.xlu0 %1742  ;;  %v3766_v10 = vpop.xlane.xlu1 %1728  ;;  %v1596_v26 = vshll.u32 %v1595_v17, 16 }
 0x749   :  { %vm1744_vm15 = vcmp.eq.f32.partialorder %v3680_v36, %v3764_v21  ;;  %vm1730_vm1 = vcmp.eq.f32.partialorder %v3682_v39, %v3766_v10  ;;  %v1581_v39 = vcvt.f32.s32 %v3702_v59 }
 0x74a   :  { %v1745_v42 = vsel %vm1744_vm15, %v1740_v55, inf  ;;  %v1731_v9 = vsel %vm1730_vm1, %v1726_v2, inf }
 0x74b   :  { %1746 = vmin.xlane.f32.xlu0 %v1745_v42  ;;  %1732 = vmin.xlane.f32.xlu1 %v1731_v9  ;;  %v1582_v45 = vshll.u32 %v1581_v39, 16  ;;  %v1665_v42 = vcvt.f32.s32 %v3734_v54  ;;  %v1651_v9 = vcvt.f32.s32 %v3736_v62  ;;  %v1693_v54 = vcvt.f32.s32 %v3744_v61 }
 0x74c   :  { %v3772_v35 = vpop.xlane.xlu0 %1770  ;;  %v3774_v60 = vpop.xlane.xlu1 %1756  ;;  %v1679_v62 = vcvt.f32.s32 %v3746_v33 }
 0x74d   :  { %vm1772_vm2 = vcmp.eq.f32.partialorder %v3694_v44, %v3772_v35  ;;  %vm1758_vm0 = vcmp.eq.f32.partialorder %v3696_v19, %v3774_v60  ;;  %v1666_v23 = vshll.u32 %v1665_v42, 16  ;;  %v1694_v61 = vshll.u32 %v1693_v54, 16 }
 0x74e   :  { %v1773_v36 = vsel %vm1772_vm2, %v1768_v0, inf  ;;  %v1759_v56 = vsel %vm1758_vm0, %v1754_v28, inf  ;;  %v1624_v28 = vshll.u32 %v1623_v31, 16  ;;  %v1680_v33 = vshll.u32 %v1679_v62, 16 }
 0x74f   :  { %1774 = vmin.xlane.f32.xlu0 %v1773_v36  ;;  %1760 = vmin.xlane.f32.xlu1 %v1759_v56  ;;  %v1735_v31 = vcvt.f32.s32 %v3766_v10 }
 0x751   :  { %v1736_v10 = vshll.u32 %v1735_v31, 16 }
 0x7bb   :  { %v1579_v5 = vpop.xlane.xlu0 %1578 }
 0x7bc   :  { %v1580_v38 = vcvt.f32.s32 %v1579_v5  ;;  %v1565_v6 = vpop.xlane.xlu1 %1564  ;;  %v1652_v5 = vshll.u32 %v1651_v9, 16 }
 0x7bd   :  { %v1566_v57 = vcvt.f32.s32 %v1565_v6 }
 0x7be   :  { %v1583_v44 = vadd.s32 %v1582_v45, %v1580_v38 }
 0x7bf   :  { %v1569_v32 = vadd.s32 %v1568_v7, %v1566_v57 }
 0x7c0   :  { %v1607_v19 = vpop.xlane.xlu0 %1606  ;;  %vm1781_vm3 = vcmp.eq.s32.totalorder %v2969_v49, %v1583_v44 }
 0x7c1   :  { %v1608_v51 = vcvt.f32.s32 %v1607_v19  ;;  %v3786_v59 = vsel %vm1781_vm3, -1.0, %v3482_v43  ;;  %vm1780_vm4 = vcmp.eq.s32.totalorder %v2969_v49, %v1569_v32  ;;  %v1721_v32 = vcvt.f32.s32 %v3754_v47 }
 0x7c2   :  { %1814 = vmax.xlane.f32.xlu0 %v3786_v59  ;;  %v3791_v63 = vsel %vm1780_vm4, -1.0, %v3487_v50  ;;  %v1638_v50 = vshll.u32 %v1637_v22, 16 }
 0x7c3   :  { %v1611_v8 = vadd.s32 %v1610_v16, %v1608_v51  ;;  %1812 = vmax.xlane.f32.xlu1 %v3791_v63  ;;  %v1707_v16 = vcvt.f32.s32 %v3756_v52  ;;  %v1722_v47 = vshll.u32 %v1721_v32, 16 }
 0x7c4   :  { %v1593_v3 = vpop.xlane.xlu1 %1592 }
 0x7c5   :  { %v1594_v55 = vcvt.f32.s32 %v1593_v3  ;;  %vm1783_vm5 = vcmp.eq.s32.totalorder %v2969_v49, %v1611_v8  ;;  %v1708_v52 = vshll.u32 %v1707_v16, 16 }
 0x7c6   :  { %v3798_v43 = vsel %vm1783_vm5, -1.0, %v3494_v58 }
 0x7c7   :  { %v1597_v2 = vadd.s32 %v1596_v26, %v1594_v55  ;;  %1818 = vmax.xlane.f32.xlu0 %v3798_v43  ;;  %v1749_v26 = vcvt.f32.s32 %v3764_v21 }
 0x7c8   :  { %v1635_v0 = vpop.xlane.xlu0 %1634  ;;  %v1621_v11 = vpop.xlane.xlu1 %1620 }
 0x7c9   :  { %v1636_v36 = vcvt.f32.s32 %v1635_v0  ;;  %v1622_v56 = vcvt.f32.s32 %v1621_v11  ;;  %vm1782_vm6 = vcmp.eq.s32.totalorder %v2969_v49, %v1597_v2  ;;  %v1750_v21 = vshll.u32 %v1749_v26, 16 }
 0x7ca   :  { %v3805_v4 = vsel %vm1782_vm6, -1.0, %v3501_v12  ;;  %v1777_v11 = vcvt.f32.s32 %v3772_v35 }
 0x7cb   :  { %v1639_v58 = vadd.s32 %v1638_v50, %v1636_v36  ;;  %v1625_v39 = vadd.s32 %v1624_v28, %v1622_v56  ;;  %1816 = vmax.xlane.f32.xlu1 %v3805_v4  ;;  %v1763_v28 = vcvt.f32.s32 %v3774_v60 }
 0x7cc   :  { %v1663_v45 = vpop.xlane.xlu0 %1662  ;;  %v1649_v48 = vpop.xlane.xlu1 %1648  ;;  %v1778_v35 = vshll.u32 %v1777_v11, 16 }
 0x7cd   :  { %v1664_v38 = vcvt.f32.s32 %v1663_v45  ;;  %v1650_v6 = vcvt.f32.s32 %v1649_v48  ;;  %vm1785_vm7 = vcmp.eq.s32.totalorder %v2969_v49, %v1639_v58  ;;  %vm1784_vm8 = vcmp.eq.s32.totalorder %v2969_v49, %v1625_v39 }
 0x7ce   :  { %v3813_v12 = vsel %vm1785_vm7, -1.0, %v3509_v29  ;;  %v3816_v7 = vsel %vm1784_vm8, -1.0, %v3512_v18  ;;  %v1764_v60 = vshll.u32 %v1763_v28, 16 }
 0x7cf   :  { %v1667_v57 = vadd.s32 %v1666_v23, %v1664_v38  ;;  %v1653_v44 = vadd.s32 %v1652_v5, %v1650_v6  ;;  %1822 = vmax.xlane.f32.xlu0 %v3813_v12  ;;  %1820 = vmax.xlane.f32.xlu1 %v3816_v7 }
 0x7d0   :  { %v1691_v19 = vpop.xlane.xlu0 %1690  ;;  %v1677_v17 = vpop.xlane.xlu1 %1676 }
 0x7d1   :  { %v1692_v51 = vcvt.f32.s32 %v1691_v19  ;;  %v1678_v29 = vcvt.f32.s32 %v1677_v17  ;;  %vm1787_vm9 = vcmp.eq.s32.totalorder %v2969_v49, %v1667_v57  ;;  %vm1786_vm10 = vcmp.eq.s32.totalorder %v2969_v49, %v1653_v44 }
 0x7d2   :  { %v3825_v18 = vsel %vm1787_vm9, -1.0, %v3521_v53  ;;  %v3828_v8 = vsel %vm1786_vm10, -1.0, %v3524_v14 }
 0x7d3   :  { %v1695_v22 = vadd.s32 %v1694_v61, %v1692_v51  ;;  %v1681_v3 = vadd.s32 %v1680_v33, %v1678_v29  ;;  %1826 = vmax.xlane.f32.xlu0 %v3825_v18  ;;  %1824 = vmax.xlane.f32.xlu1 %v3828_v8 }
 0x7d4   :  { %v1719_v55 = vpop.xlane.xlu0 %1718  ;;  %v1705_v2 = vpop.xlane.xlu1 %1704 }
 0x7d5   :  { %v1720_v50 = vcvt.f32.s32 %v1719_v55  ;;  %v1706_v53 = vcvt.f32.s32 %v1705_v2  ;;  %vm1789_vm11 = vcmp.eq.s32.totalorder %v2969_v49, %v1695_v22  ;;  %vm1788_vm12 = vcmp.eq.s32.totalorder %v2969_v49, %v1681_v3 }
 0x7d6   :  { %v3837_v14 = vsel %vm1789_vm11, -1.0, %v3533_v1  ;;  %v3840_v42 = vsel %vm1788_vm12, -1.0, %v3536_v24 }
 0x7d7   :  { %v1723_v9 = vadd.s32 %v1722_v47, %v1720_v50  ;;  %v1709_v0 = vadd.s32 %v1708_v52, %v1706_v53  ;;  %1830 = vmax.xlane.f32.xlu0 %v3837_v14  ;;  %1828 = vmax.xlane.f32.xlu1 %v3840_v42 }
 0x7d8   :  { %v1747_v36 = vpop.xlane.xlu0 %1746  ;;  %v1733_v56 = vpop.xlane.xlu1 %1732 }
 0x7d9   :  { %v1748_v58 = vcvt.f32.s32 %v1747_v36  ;;  %v1734_v1 = vcvt.f32.s32 %v1733_v56  ;;  %vm1791_vm13 = vcmp.eq.s32.totalorder %v2969_v49, %v1723_v9  ;;  %vm1790_vm14 = vcmp.eq.s32.totalorder %v2969_v49, %v1709_v0 }
 0x7da   :  { %v3849_v24 = vsel %vm1791_vm13, -1.0, %v3545_v46  ;;  %v3852_v39 = vsel %vm1790_vm14, -1.0, %v3548_v25 }
 0x7db   :  { %v1751_v23 = vadd.s32 %v1750_v21, %v1748_v58  ;;  %v1737_v5 = vadd.s32 %v1736_v10, %v1734_v1  ;;  %1834 = vmax.xlane.f32.xlu0 %v3849_v24  ;;  %1832 = vmax.xlane.f32.xlu1 %v3852_v39 }
 0x7dc   :  { %v1775_v54 = vpop.xlane.xlu0 %1774  ;;  %v1761_v62 = vpop.xlane.xlu1 %1760 }
 0x7dd   :  { %v1776_v45 = vcvt.f32.s32 %v1775_v54  ;;  %v1762_v48 = vcvt.f32.s32 %v1761_v62  ;;  %vm1793_vm15 = vcmp.eq.s32.totalorder %v2969_v49, %v1751_v23  ;;  %vm1792_vm1 = vcmp.eq.s32.totalorder %v2969_v49, %v1737_v5 }
 0x7de   :  { %v3859_v46 = vsel %vm1793_vm15, -1.0, %v3555_v41  ;;  %v3862_v25 = vsel %vm1792_vm1, -1.0, %v3558_v27 }
 0x7df   :  { %v1779_v38 = vadd.s32 %v1778_v35, %v1776_v45  ;;  %v1765_v6 = vadd.s32 %v1764_v60, %v1762_v48  ;;  %1838 = vmax.xlane.f32.xlu0 %v3859_v46  ;;  %1836 = vmax.xlane.f32.xlu1 %v3862_v25 }
 0x7e1   :  { %vm1795_vm2 = vcmp.eq.s32.totalorder %v2969_v49, %v1779_v38  ;;  %vm1794_vm0 = vcmp.eq.s32.totalorder %v2969_v49, %v1765_v6 }
 0x7e2   :  { %v3869_v57 = vsel %vm1795_vm2, -1.0, %v3565_v34  ;;  %v3872_v44 = vsel %vm1794_vm0, -1.0, %v3568_v40 }
 0x7e3   :  { %1842 = vmax.xlane.f32.xlu0 %v3869_v57  ;;  %1840 = vmax.xlane.f32.xlu1 %v3872_v44 }
 0x84f   :  { %v1815_v41 = vpop.xlane.xlu0 %1814 }
 0x850   :  { %vm1845_vm3 = vcmp.eq.f32.partialorder %v3786_v59, %v1815_v41  ;;  %v1813_v27 = vpop.xlane.xlu1 %1812 }
 0x851   :  { %v3878_v61 = vsel %vm1845_vm3, %v2969_v49, 128  ;;  %vm1844_vm4 = vcmp.eq.f32.partialorder %v3791_v63, %v1813_v27 }
 0x852   :  { %v1891_v33 = vshra.s32 %v3878_v61, 16  ;;  %v3883_v34 = vsel %vm1844_vm4, %v2969_v49, 128 }
 0x853   :  { %v1877_v40 = vshra.s32 %v3883_v34, 16 }
 0x854   :  { %v3886_v32 = vcvt.s32.f32 %v1891_v33  ;;  %v1819_v16 = vpop.xlane.xlu0 %1818 }
 0x855   :  { %v3888_v19 = vcvt.s32.f32 %v1877_v40  ;;  %vm1847_vm5 = vcmp.eq.f32.partialorder %v3798_v43, %v1819_v16 }
 0x856   :  { %v3892_v17 = vsel %vm1847_vm5, %v2969_v49, 128  ;;  %1894 = vmin.xlane.f32.xlu0 %v3886_v32 }
 0x857   :  { %v1919_v51 = vshra.s32 %v3892_v17, 16  ;;  %1880 = vmin.xlane.f32.xlu1 %v3888_v19 }
 0x858   :  { %v1817_v29 = vpop.xlane.xlu1 %1816 }
 0x859   :  { %v3897_v22 = vcvt.s32.f32 %v1919_v51  ;;  %vm1846_vm6 = vcmp.eq.f32.partialorder %v3805_v4, %v1817_v29 }
 0x85a   :  { %v3901_v3 = vsel %vm1846_vm6, %v2969_v49, 128 }
 0x85b   :  { %v1905_v47 = vshra.s32 %v3901_v3, 16  ;;  %1922 = vmin.xlane.f32.xlu0 %v3897_v22 }
 0x85c   :  { %v1823_v52 = vpop.xlane.xlu0 %1822  ;;  %v1821_v26 = vpop.xlane.xlu1 %1820 }
 0x85d   :  { %v3905_v31 = vcvt.s32.f32 %v1905_v47  ;;  %vm1849_vm7 = vcmp.eq.f32.partialorder %v3813_v12, %v1823_v52  ;;  %vm1848_vm8 = vcmp.eq.f32.partialorder %v3816_v7, %v1821_v26 }
 0x85e   :  { %v3910_v55 = vsel %vm1849_vm7, %v2969_v49, 128  ;;  %v3913_v2 = vsel %vm1848_vm8, %v2969_v49, 128 }
 0x85f   :  { %v1947_v50 = vshra.s32 %v3910_v55, 16  ;;  %v1933_v53 = vshra.s32 %v3913_v2, 16  ;;  %1908 = vmin.xlane.f32.xlu1 %v3905_v31 }
 0x860   :  { %v1827_v9 = vpop.xlane.xlu0 %1826  ;;  %v1825_v0 = vpop.xlane.xlu1 %1824 }
 0x861   :  { %v3918_v21 = vcvt.s32.f32 %v1947_v50  ;;  %v3920_v10 = vcvt.s32.f32 %v1933_v53  ;;  %vm1851_vm9 = vcmp.eq.f32.partialorder %v3825_v18, %v1827_v9  ;;  %vm1850_vm10 = vcmp.eq.f32.partialorder %v3828_v8, %v1825_v0 }
 0x862   :  { %v3925_v11 = vsel %vm1851_vm9, %v2969_v49, 128  ;;  %v3928_v28 = vsel %vm1850_vm10, %v2969_v49, 128 }
 0x863   :  { %1950 = vmin.xlane.f32.xlu0 %v3918_v21  ;;  %1936 = vmin.xlane.f32.xlu1 %v3920_v10  ;;  %v1975_v36 = vshra.s32 %v3925_v11, 16  ;;  %v1961_v56 = vshra.s32 %v3928_v28, 16 }
 0x864   :  { %v1831_v58 = vpop.xlane.xlu0 %1830  ;;  %v1829_v1 = vpop.xlane.xlu1 %1828 }
 0x865   :  { %vm1853_vm11 = vcmp.eq.f32.partialorder %v3837_v14, %v1831_v58  ;;  %vm1852_vm12 = vcmp.eq.f32.partialorder %v3840_v42, %v1829_v1  ;;  %v3936_v23 = vcvt.s32.f32 %v1975_v36  ;;  %v3938_v5 = vcvt.s32.f32 %v1961_v56 }
 0x866   :  { %v3941_v35 = vsel %vm1853_vm11, %v2969_v49, 128  ;;  %v3944_v60 = vsel %vm1852_vm12, %v2969_v49, 128 }
 0x867   :  { %v2003_v54 = vshra.s32 %v3941_v35, 16  ;;  %v1989_v62 = vshra.s32 %v3944_v60, 16  ;;  %1978 = vmin.xlane.f32.xlu0 %v3936_v23  ;;  %1964 = vmin.xlane.f32.xlu1 %v3938_v5 }
 0x868   :  { %v1835_v45 = vpop.xlane.xlu0 %1834  ;;  %v1833_v48 = vpop.xlane.xlu1 %1832 }
 0x869   :  { %vm1855_vm13 = vcmp.eq.f32.partialorder %v3849_v24, %v1835_v45  ;;  %vm1854_vm14 = vcmp.eq.f32.partialorder %v3852_v39, %v1833_v48  ;;  %v3952_v38 = vcvt.s32.f32 %v2003_v54  ;;  %v3954_v6 = vcvt.s32.f32 %v1989_v62 }
 0x86a   :  { %v3957_v41 = vsel %vm1855_vm13, %v2969_v49, 128  ;;  %v3960_v27 = vsel %vm1854_vm14, %v2969_v49, 128 }
 0x86b   :  { %v2031_v33 = vshra.s32 %v3957_v41, 16  ;;  %v2017_v40 = vshra.s32 %v3960_v27, 16  ;;  %2006 = vmin.xlane.f32.xlu0 %v3952_v38  ;;  %1992 = vmin.xlane.f32.xlu1 %v3954_v6 }
 0x86c   :  { %v1839_v16 = vpop.xlane.xlu0 %1838  ;;  %v1837_v51 = vpop.xlane.xlu1 %1836 }
 0x86d   :  { %vm1857_vm15 = vcmp.eq.f32.partialorder %v3859_v46, %v1839_v16  ;;  %vm1856_vm1 = vcmp.eq.f32.partialorder %v3862_v25, %v1837_v51  ;;  %v3968_v29 = vcvt.s32.f32 %v2031_v33  ;;  %v3970_v47 = vcvt.s32.f32 %v2017_v40 }
 0x86e   :  { %v3973_v52 = vsel %vm1857_vm15, %v2969_v49, 128  ;;  %v3976_v26 = vsel %vm1856_vm1, %v2969_v49, 128  ;;  %v1890_v33 = vand.u32 65535, %v3878_v61  ;;  %v1876_v40 = vand.u32 65535, %v3883_v34 }
 0x86f   :  { %v2059_v50 = vshra.s32 %v3973_v52, 16  ;;  %v2045_v53 = vshra.s32 %v3976_v26, 16  ;;  %2034 = vmin.xlane.f32.xlu0 %v3968_v29  ;;  %2020 = vmin.xlane.f32.xlu1 %v3970_v47  ;;  %v1904_v34 = vand.u32 65535, %v3901_v3 }
 0x870   :  { %v1843_v9 = vpop.xlane.xlu0 %1842  ;;  %v1841_v0 = vpop.xlane.xlu1 %1840  ;;  %v1892_v16 = vcvt.s32.f32 %v1890_v33  ;;  %v1946_v33 = vand.u32 65535, %v3910_v55 }
 0x871   :  { %vm1859_vm2 = vcmp.eq.f32.partialorder %v3869_v57, %v1843_v9  ;;  %vm1858_vm0 = vcmp.eq.f32.partialorder %v3872_v44, %v1841_v0  ;;  %v3984_v36 = vcvt.s32.f32 %v2059_v50  ;;  %v3986_v56 = vcvt.s32.f32 %v2045_v53 }
 0x872   :  { %v3989_v58 = vsel %vm1859_vm2, %v2969_v49, 128  ;;  %v3992_v1 = vsel %vm1858_vm0, %v2969_v49, 128  ;;  %v1878_v50 = vcvt.s32.f32 %v1876_v40  ;;  %v1918_v53 = vand.u32 65535, %v3892_v17 }
 0x873   :  { %v2087_v54 = vshra.s32 %v3989_v58, 16  ;;  %v2073_v62 = vshra.s32 %v3992_v1, 16  ;;  %2062 = vmin.xlane.f32.xlu0 %v3984_v36  ;;  %2048 = vmin.xlane.f32.xlu1 %v3986_v56  ;;  %v1932_v40 = vand.u32 65535, %v3913_v2  ;;  %v1948_v3 = vcvt.s32.f32 %v1946_v33 }
 0x874   :  { %v1920_v61 = vcvt.s32.f32 %v1918_v53 }
 0x875   :  { %v3998_v45 = vcvt.s32.f32 %v2087_v54  ;;  %v4000_v48 = vcvt.s32.f32 %v2073_v62 }
 0x877   :  { %2090 = vmin.xlane.f32.xlu0 %v3998_v45  ;;  %2076 = vmin.xlane.f32.xlu1 %v4000_v48 }
 0x8e3   :  { %v4006_v51 = vpop.xlane.xlu0 %1894 }
 0x8e4   :  { %vm1896_vm3 = vcmp.eq.f32.partialorder %v3886_v32, %v4006_v51  ;;  %v4011_v9 = vpop.xlane.xlu1 %1880  ;;  %v1906_v32 = vcvt.s32.f32 %v1904_v34  ;;  %v2002_v34 = vand.u32 65535, %v3941_v35  ;;  %v2030_v35 = vand.u32 65535, %v3957_v41 }
 0x8e5   :  { %vm1882_vm4 = vcmp.eq.f32.partialorder %v3888_v19, %v4011_v9  ;;  %v1897_v0 = vsel %vm1896_vm3, %v1892_v16, inf  ;;  %v2058_v41 = vand.u32 65535, %v3973_v52  ;;  %v2086_v52 = vand.u32 65535, %v3989_v58 }
 0x8e6   :  { %1898 = vmin.xlane.f32.xlu0 %v1897_v0  ;;  %v1883_v54 = vsel %vm1882_vm4, %v1878_v50, inf  ;;  %v1934_v50 = vcvt.s32.f32 %v1932_v40 }
 0x8e7   :  { %1884 = vmin.xlane.f32.xlu1 %v1883_v54  ;;  %v1960_v54 = vand.u32 65535, %v3928_v28  ;;  %v2004_v28 = vcvt.s32.f32 %v2002_v34  ;;  %v2088_v34 = vcvt.s32.f32 %v2086_v52 }
 0x8e8   :  { %v4016_v62 = vpop.xlane.xlu0 %1922 }
 0x8e9   :  { %vm1924_vm5 = vcmp.eq.f32.partialorder %v3897_v22, %v4016_v62  ;;  %v1974_v22 = vand.u32 65535, %v3925_v11 }
 0x8ea   :  { %v1925_v17 = vsel %vm1924_vm5, %v1920_v61, inf  ;;  %v1962_v61 = vcvt.s32.f32 %v1960_v54 }
 0x8eb   :  { %1926 = vmin.xlane.f32.xlu0 %v1925_v17  ;;  %v1976_v2 = vcvt.s32.f32 %v1974_v22  ;;  %v1988_v17 = vand.u32 65535, %v3944_v60  ;;  %v2016_v60 = vand.u32 65535, %v3960_v27  ;;  %v2044_v27 = vand.u32 65535, %v3976_v26 }
 0x8ec   :  { %v4022_v19 = vpop.xlane.xlu1 %1908  ;;  %v2072_v26 = vand.u32 65535, %v3992_v1 }
 0x8ed   :  { %vm1910_vm6 = vcmp.eq.f32.partialorder %v3905_v31, %v4022_v19  ;;  %v1990_v33 = vcvt.s32.f32 %v1988_v17 }
 0x8ee   :  { %v1911_v16 = vsel %vm1910_vm6, %v1906_v32, inf  ;;  %v2074_v17 = vcvt.s32.f32 %v2072_v26 }
 0x8ef   :  { %1912 = vmin.xlane.f32.xlu1 %v1911_v16 }
 0x8f0   :  { %v4026_v53 = vpop.xlane.xlu0 %1950  ;;  %v4028_v0 = vpop.xlane.xlu1 %1936 }
 0x8f1   :  { %vm1952_vm7 = vcmp.eq.f32.partialorder %v3918_v21, %v4026_v53  ;;  %vm1938_vm8 = vcmp.eq.f32.partialorder %v3920_v10, %v4028_v0  ;;  %v1943_v52 = vcvt.f32.s32 %v4028_v0 }
 0x8f2   :  { %v1953_v55 = vsel %vm1952_vm7, %v1948_v3, inf  ;;  %v1939_v31 = vsel %vm1938_vm8, %v1934_v50, inf  ;;  %v2032_v3 = vcvt.s32.f32 %v2030_v35  ;;  %v2018_v50 = vcvt.s32.f32 %v2016_v60 }
 0x8f3   :  { %1954 = vmin.xlane.f32.xlu0 %v1953_v55  ;;  %1940 = vmin.xlane.f32.xlu1 %v1939_v31  ;;  %v2060_v55 = vcvt.s32.f32 %v2058_v41  ;;  %v2046_v31 = vcvt.s32.f32 %v2044_v27  ;;  %v1929_v35 = vcvt.f32.s32 %v4016_v62  ;;  %v1915_v27 = vcvt.f32.s32 %v4022_v19 }
 0x8f4   :  { %v4038_v32 = vpop.xlane.xlu0 %1978  ;;  %v4040_v11 = vpop.xlane.xlu1 %1964 }
 0x8f5   :  { %vm1980_vm9 = vcmp.eq.f32.partialorder %v3936_v23, %v4038_v32  ;;  %vm1966_vm10 = vcmp.eq.f32.partialorder %v3938_v5, %v4040_v11  ;;  %v1930_v41 = vshll.u32 %v1929_v35, 16 }
 0x8f6   :  { %v1981_v21 = vsel %vm1980_vm9, %v1976_v2, inf  ;;  %v1967_v10 = vsel %vm1966_vm10, %v1962_v61, inf }
 0x8f7   :  { %1982 = vmin.xlane.f32.xlu0 %v1981_v21  ;;  %1968 = vmin.xlane.f32.xlu1 %v1967_v10  ;;  %v1887_v10 = vcvt.f32.s32 %v4011_v9 }
 0x8f8   :  { %v4048_v40 = vpop.xlane.xlu0 %2006  ;;  %v4050_v16 = vpop.xlane.xlu1 %1992 }
 0x8f9   :  { %vm2008_vm11 = vcmp.eq.f32.partialorder %v3952_v38, %v4048_v40  ;;  %vm1994_vm12 = vcmp.eq.f32.partialorder %v3954_v6, %v4050_v16 }
 0x8fa   :  { %v2009_v23 = vsel %vm2008_vm11, %v2004_v28, inf  ;;  %v1995_v5 = vsel %vm1994_vm12, %v1990_v33, inf }
 0x8fb   :  { %2010 = vmin.xlane.f32.xlu0 %v2009_v23  ;;  %1996 = vmin.xlane.f32.xlu1 %v1995_v5  ;;  %v1888_v5 = vshll.u32 %v1887_v10, 16 }
 0x8fc   :  { %v4058_v22 = vpop.xlane.xlu0 %2034  ;;  %v4060_v54 = vpop.xlane.xlu1 %2020 }
 0x8fd   :  { %vm2036_vm13 = vcmp.eq.f32.partialorder %v3968_v29, %v4058_v22  ;;  %vm2022_vm14 = vcmp.eq.f32.partialorder %v3970_v47, %v4060_v54 }
 0x8fe   :  { %v2037_v38 = vsel %vm2036_vm13, %v2032_v3, inf  ;;  %v2023_v6 = vsel %vm2022_vm14, %v2018_v50, inf }
 0x8ff   :  { %2038 = vmin.xlane.f32.xlu0 %v2037_v38  ;;  %2024 = vmin.xlane.f32.xlu1 %v2023_v6  ;;  %v1957_v6 = vcvt.f32.s32 %v4026_v53 }
 0x900   :  { %v4068_v2 = vpop.xlane.xlu0 %2062  ;;  %v4070_v61 = vpop.xlane.xlu1 %2048 }
 0x901   :  { %vm2064_vm15 = vcmp.eq.f32.partialorder %v3984_v36, %v4068_v2  ;;  %vm2050_vm1 = vcmp.eq.f32.partialorder %v3986_v56, %v4070_v61  ;;  %v1901_v56 = vcvt.f32.s32 %v4006_v51 }
 0x902   :  { %v2065_v29 = vsel %vm2064_vm15, %v2060_v55, inf  ;;  %v2051_v47 = vsel %vm2050_vm1, %v2046_v31, inf  ;;  %v1916_v31 = vshll.u32 %v1915_v27, 16 }
 0x903   :  { %2066 = vmin.xlane.f32.xlu0 %v2065_v29  ;;  %2052 = vmin.xlane.f32.xlu1 %v2051_v47  ;;  %v1902_v33 = vshll.u32 %v1901_v56, 16  ;;  %v1985_v47 = vcvt.f32.s32 %v4038_v32  ;;  %v1999_v32 = vcvt.f32.s32 %v4050_v16  ;;  %v2041_v16 = vcvt.f32.s32 %v4058_v22 }
 0x904   :  { %v4076_v21 = vpop.xlane.xlu0 %2090  ;;  %v4078_v58 = vpop.xlane.xlu1 %2076 }
 0x905   :  { %vm2092_vm2 = vcmp.eq.f32.partialorder %v3998_v45, %v4076_v21  ;;  %vm2078_vm0 = vcmp.eq.f32.partialorder %v4000_v48, %v4078_v58 }
 0x906   :  { %v2093_v36 = vsel %vm2092_vm2, %v2088_v34, inf  ;;  %v2079_v1 = vsel %vm2078_vm0, %v2074_v17, inf }
 0x907   :  { %2094 = vmin.xlane.f32.xlu0 %v2093_v36  ;;  %2080 = vmin.xlane.f32.xlu1 %v2079_v1  ;;  %v1944_v36 = vshll.u32 %v1943_v52, 16 }
 0x973   :  { %v1899_v28 = vpop.xlane.xlu0 %1898 }
 0x974   :  { %v1900_v60 = vcvt.f32.s32 %v1899_v28  ;;  %v1885_v23 = vpop.xlane.xlu1 %1884 }
 0x975   :  { %v1886_v3 = vcvt.f32.s32 %v1885_v23 }
 0x976   :  { %v1903_v45 = vadd.s32 %v1902_v33, %v1900_v60  ;;  %v2013_v33 = vcvt.f32.s32 %v4048_v40  ;;  %v2000_v40 = vshll.u32 %v1999_v32, 16 }
 0x977   :  { %v1889_v50 = vadd.s32 %v1888_v5, %v1886_v3 }
 0x978   :  { %v1927_v48 = vpop.xlane.xlu0 %1926  ;;  %vm2101_vm3 = vcmp.eq.s32.totalorder %v2969_v49, %v1903_v45 }
 0x979   :  { %v1928_v38 = vcvt.f32.s32 %v1927_v48  ;;  %v2117_v51 = vsel %vm2101_vm3, -1.0, %v3786_v59  ;;  %vm2100_vm4 = vcmp.eq.s32.totalorder %v2969_v49, %v1889_v50  ;;  %v1958_v59 = vshll.u32 %v1957_v6, 16 }
 0x97a   :  { %2134 = vmax.xlane.f32.xlu0 %v2117_v51  ;;  %v2116_v9 = vsel %vm2100_vm4, -1.0, %v3791_v63  ;;  %v1971_v63 = vcvt.f32.s32 %v4040_v11  ;;  %v2014_v50 = vshll.u32 %v2013_v33, 16  ;;  %v2042_v6 = vshll.u32 %v2041_v16, 16  ;;  %v4222_v16 = vld [vmem:[#allocation9_spill] sm:$0xff] }
 0x97b   :  { %v1931_v62 = vadd.s32 %v1930_v41, %v1928_v38  ;;  %2132 = vmax.xlane.f32.xlu1 %v2116_v9  ;;  %v2027_v41 = vcvt.f32.s32 %v4060_v54  ;;  %v2069_v54 = vcvt.f32.s32 %v4068_v2 }
 0x97c   :  { %v1913_v55 = vpop.xlane.xlu1 %1912  ;;  %v1972_v28 = vshll.u32 %v1971_v63, 16  ;;  %v2083_v63 = vcvt.f32.s32 %v4078_v58 }
 0x97d   :  { %v1914_v26 = vcvt.f32.s32 %v1913_v55  ;;  %vm2103_vm5 = vcmp.eq.s32.totalorder %v2969_v49, %v1931_v62  ;;  %v2028_v22 = vshll.u32 %v2027_v41, 16  ;;  %v2055_v55 = vcvt.f32.s32 %v4070_v61 }
 0x97e   :  { %v2119_v19 = vsel %vm2103_vm5, -1.0, %v3798_v43  ;;  %v1986_v43 = vshll.u32 %v1985_v47, 16  ;;  %v2070_v47 = vshll.u32 %v2069_v54, 16  ;;  %v2097_v61 = vcvt.f32.s32 %v4076_v21 }
 0x97f   :  { %v1917_v29 = vadd.s32 %v1916_v31, %v1914_v26  ;;  %2138 = vmax.xlane.f32.xlu0 %v2119_v19  ;;  %v2056_v2 = vshll.u32 %v2055_v55, 16  ;;  %v2084_v21 = vshll.u32 %v2083_v63, 16 }
 0x980   :  { %v1955_v34 = vpop.xlane.xlu0 %1954  ;;  %v1941_v17 = vpop.xlane.xlu1 %1940 }
 0x981   :  { %v1956_v53 = vcvt.f32.s32 %v1955_v34  ;;  %v1942_v1 = vcvt.f32.s32 %v1941_v17  ;;  %vm2102_vm6 = vcmp.eq.s32.totalorder %v2969_v49, %v1917_v29 }
 0x982   :  { %v2118_v0 = vsel %vm2102_vm6, -1.0, %v3805_v4 }
 0x983   :  { %v1959_v56 = vadd.s32 %v1958_v59, %v1956_v53  ;;  %v1945_v10 = vadd.s32 %v1944_v36, %v1942_v1  ;;  %2136 = vmax.xlane.f32.xlu1 %v2118_v0 }
 0x984   :  { %v1983_v35 = vpop.xlane.xlu0 %1982  ;;  %v1969_v11 = vpop.xlane.xlu1 %1968 }
 0x985   :  { %vm2105_vm7 = vcmp.eq.s32.totalorder %v2969_v49, %v1959_v56  ;;  %vm2104_vm8 = vcmp.eq.s32.totalorder %v2969_v49, %v1945_v10  ;;  %v1984_v60 = vcvt.f32.s32 %v1983_v35  ;;  %v1970_v23 = vcvt.f32.s32 %v1969_v11 }
 0x986   :  { %v2121_v5 = vsel %vm2105_vm7, -1.0, %v3813_v12  ;;  %v2120_v4 = vsel %vm2104_vm8, -1.0, %v3816_v7  ;;  %v2098_v56 = vshll.u32 %v2097_v61, 16 }
 0x987   :  { %2142 = vmax.xlane.f32.xlu0 %v2121_v5  ;;  %2140 = vmax.xlane.f32.xlu1 %v2120_v4  ;;  %v1987_v3 = vadd.s32 %v1986_v43, %v1984_v60  ;;  %v1973_v45 = vadd.s32 %v1972_v28, %v1970_v23 }
 0x988   :  { %v2011_v48 = vpop.xlane.xlu0 %2010  ;;  %v1997_v27 = vpop.xlane.xlu1 %1996 }
 0x989   :  { %v2012_v38 = vcvt.f32.s32 %v2011_v48  ;;  %v1998_v51 = vcvt.f32.s32 %v1997_v27  ;;  %vm2107_vm9 = vcmp.eq.s32.totalorder %v2969_v49, %v1987_v3  ;;  %vm2106_vm10 = vcmp.eq.s32.totalorder %v2969_v49, %v1973_v45  ;;  %v4220_v3 = vld [vmem:[#allocation8_spill] sm:$0xff] }
 0x98a   :  { %v2123_v12 = vsel %vm2107_vm9, -1.0, %v3825_v18  ;;  %v2122_v7 = vsel %vm2106_vm10, -1.0, %v3828_v8 }
 0x98b   :  { %v2015_v9 = vadd.s32 %v2014_v50, %v2012_v38  ;;  %v2001_v62 = vadd.s32 %v2000_v40, %v1998_v51  ;;  %2146 = vmax.xlane.f32.xlu0 %v2123_v12  ;;  %2144 = vmax.xlane.f32.xlu1 %v2122_v7  ;;  %v4221_v40 = vld [vmem:[#allocation10_spill] sm:$0xff]  ;;  %v4223_v38 = vld [vmem:[#allocation12_spill] sm:$0xff] }
 0x98c   :  { %v2039_v31 = vpop.xlane.xlu0 %2038  ;;  %v2025_v52 = vpop.xlane.xlu1 %2024 }
 0x98d   :  { %v2040_v26 = vcvt.f32.s32 %v2039_v31  ;;  %v2026_v19 = vcvt.f32.s32 %v2025_v52  ;;  %vm2109_vm11 = vcmp.eq.s32.totalorder %v2969_v49, %v2015_v9  ;;  %vm2108_vm12 = vcmp.eq.s32.totalorder %v2969_v49, %v2001_v62  ;;  %v4225_v62 = vld [vmem:[#allocation14_spill] sm:$0xff]  ;;  %v4227_v52 = vld [vmem:[#allocation16_spill] sm:$0xff] }
 0x98e   :  { %v2125_v18 = vsel %vm2109_vm11, -1.0, %v3837_v14  ;;  %v2124_v8 = vsel %vm2108_vm12, -1.0, %v3840_v42 }
 0x98f   :  { %v2043_v29 = vadd.s32 %v2042_v6, %v2040_v26  ;;  %v2029_v59 = vadd.s32 %v2028_v22, %v2026_v19  ;;  %2150 = vmax.xlane.f32.xlu0 %v2125_v18  ;;  %2148 = vmax.xlane.f32.xlu1 %v2124_v8  ;;  %v4226_v6 = vld [vmem:[#allocation13_spill] sm:$0xff]  ;;  %v4228_v26 = vld [vmem:[#allocation15_spill] sm:$0xff] }
 0x990   :  { %v2067_v34 = vpop.xlane.xlu0 %2066  ;;  %v2053_v17 = vpop.xlane.xlu1 %2052 }
 0x991   :  { %v2068_v36 = vcvt.f32.s32 %v2067_v34  ;;  %v2054_v53 = vcvt.f32.s32 %v2053_v17  ;;  %vm2111_vm13 = vcmp.eq.s32.totalorder %v2969_v49, %v2043_v29  ;;  %vm2110_vm14 = vcmp.eq.s32.totalorder %v2969_v49, %v2029_v59  ;;  %v4229_v59 = vld [vmem:[#allocation18_spill] sm:$0xff] }
 0x992   :  { %v2127_v14 = vsel %vm2111_vm13, -1.0, %v3849_v24  ;;  %v2126_v42 = vsel %vm2110_vm14, -1.0, %v3852_v39 }
 0x993   :  { %v2071_v1 = vadd.s32 %v2070_v47, %v2068_v36  ;;  %v2057_v0 = vadd.s32 %v2056_v2, %v2054_v53  ;;  %2154 = vmax.xlane.f32.xlu0 %v2127_v14  ;;  %2152 = vmax.xlane.f32.xlu1 %v2126_v42  ;;  %v4230_v47 = vld [vmem:[#allocation17_spill] sm:$0xff] }
 0x994   :  { %v2095_v10 = vpop.xlane.xlu0 %2094  ;;  %v2081_v58 = vpop.xlane.xlu1 %2080 }
 0x995   :  { %v2096_v43 = vcvt.f32.s32 %v2095_v10  ;;  %v2082_v28 = vcvt.f32.s32 %v2081_v58  ;;  %vm2113_vm15 = vcmp.eq.s32.totalorder %v2969_v49, %v2071_v1  ;;  %vm2112_vm1 = vcmp.eq.s32.totalorder %v2969_v49, %v2057_v0 }
 0x996   :  { %v2129_v33 = vsel %vm2113_vm15, -1.0, %v3859_v46  ;;  %v2128_v24 = vsel %vm2112_vm1, -1.0, %v3862_v25 }
 0x997   :  { %v2099_v32 = vadd.s32 %v2098_v56, %v2096_v43  ;;  %v2085_v39 = vadd.s32 %v2084_v21, %v2082_v28  ;;  %2158 = vmax.xlane.f32.xlu0 %v2129_v33  ;;  %2156 = vmax.xlane.f32.xlu1 %v2128_v24 }
 0x999   :  { %vm2115_vm2 = vcmp.eq.s32.totalorder %v2969_v49, %v2099_v32  ;;  %vm2114_vm0 = vcmp.eq.s32.totalorder %v2969_v49, %v2085_v39 }
 0x99a   :  { %v2131_v35 = vsel %vm2115_vm2, -1.0, %v3869_v57  ;;  %v2130_v11 = vsel %vm2114_vm0, -1.0, %v3872_v44 }
 0x99b   :  { %2162 = vmax.xlane.f32.xlu0 %v2131_v35  ;;  %2160 = vmax.xlane.f32.xlu1 %v2130_v11 }
 0xa07   :  { %v2135_v60 = vpop.xlane.xlu0 %2134 }
 0xa08   :  { %vm2165_vm3 = vcmp.ge.f32.partialorder %v3220_v13, %v2135_v60  ;;  %v2133_v46 = vpop.xlane.xlu1 %2132 }
 0xa09   :  { %v2181_v25 = vsel %vm2165_vm3, %v3220_v13, 0.0  ;;  %vm2164_vm4 = vcmp.ge.f32.partialorder %v3222_v15, %v2133_v46 }
 0xa0a   :  { %2197 = vst [vmem:[#allocation5 + $0x8] sm:$0xff] %v2181_v25  ;;  %v2180_v23 = vsel %vm2164_vm4, %v3222_v15, 0.0 }
 0xa0b   :  { %2196 = vst [vmem:[#allocation5] sm:$0xff] %v2180_v23 }
 0xa0c   :  { %v2139_v5 = vpop.xlane.xlu0 %2138 }
 0xa0d   :  { %vm2167_vm5 = vcmp.ge.f32.partialorder %v3226_v20, %v2139_v5 }
 0xa0e   :  { %v2183_v49 = vsel %vm2167_vm5, %v3226_v20, 0.0 }
 0xa0f   :  { %2199 = vst [vmem:[#allocation5 + $0x18] sm:$0xff] %v2183_v49 }
 0xa10   :  { %v2137_v57 = vpop.xlane.xlu1 %2136 }
 0xa11   :  { %vm2166_vm6 = vcmp.ge.f32.partialorder %v3229_v30, %v2137_v57 }
 0xa12   :  { %v2182_v44 = vsel %vm2166_vm6, %v3229_v30, 0.0 }
 0xa13   :  { %2198 = vst [vmem:[#allocation5 + $0x10] sm:$0xff] %v2182_v44 }
 0xa14   :  { %v2143_v4 = vpop.xlane.xlu0 %2142  ;;  %v2141_v13 = vpop.xlane.xlu1 %2140 }
 0xa15   :  { %vm2169_vm7 = vcmp.ge.f32.partialorder %v3235_v37, %v2143_v4  ;;  %vm2168_vm8 = vcmp.ge.f32.partialorder %v4220_v3, %v2141_v13 }
 0xa16   :  { %v2185_v15 = vsel %vm2169_vm7, %v3235_v37, 0.0  ;;  %v2184_v45 = vsel %vm2168_vm8, %v4220_v3, 0.0  ;;  %v4224_v37 = vld [vmem:[#allocation11_spill] sm:$0xff] }
 0xa17   :  { %2201 = vst [vmem:[#allocation5 + $0x28] sm:$0xff] %v2185_v15  ;;  %2200 = vst [vmem:[#allocation5 + $0x20] sm:$0xff] %v2184_v45 }
 0xa18   :  { %v2147_v20 = vpop.xlane.xlu0 %2146  ;;  %v2145_v50 = vpop.xlane.xlu1 %2144 }
 0xa19   :  { %vm2171_vm9 = vcmp.ge.f32.partialorder %v4221_v40, %v2147_v20  ;;  %vm2170_vm10 = vcmp.ge.f32.partialorder %v4222_v16, %v2145_v50 }
 0xa1a   :  { %v2187_v30 = vsel %vm2171_vm9, %v4221_v40, 0.0  ;;  %v2186_v41 = vsel %vm2170_vm10, %v4222_v16, 0.0 }
 0xa1b   :  { %2203 = vst [vmem:[#allocation5 + $0x38] sm:$0xff] %v2187_v30  ;;  %2202 = vst [vmem:[#allocation5 + $0x30] sm:$0xff] %v2186_v41 }
 0xa1c   :  { %v2151_v48 = vpop.xlane.xlu0 %2150  ;;  %v2149_v27 = vpop.xlane.xlu1 %2148 }
 0xa1d   :  { %vm2173_vm11 = vcmp.ge.f32.partialorder %v4223_v38, %v2151_v48  ;;  %vm2172_vm12 = vcmp.ge.f32.partialorder %v4224_v37, %v2149_v27 }
 0xa1e   :  { %v2189_v51 = vsel %vm2173_vm11, %v4223_v38, 0.0  ;;  %v2188_v12 = vsel %vm2172_vm12, %v4224_v37, 0.0 }
 0xa1f   :  { %2205 = vst [vmem:[#allocation5 + $0x48] sm:$0xff] %v2189_v51  ;;  %2204 = vst [vmem:[#allocation5 + $0x40] sm:$0xff] %v2188_v12 }
 0xa20   :  { %v2155_v7 = vpop.xlane.xlu0 %2154  ;;  %v2153_v9 = vpop.xlane.xlu1 %2152 }
 0xa21   :  { %vm2175_vm13 = vcmp.ge.f32.partialorder %v4225_v62, %v2155_v7  ;;  %vm2174_vm14 = vcmp.ge.f32.partialorder %v4226_v6, %v2153_v9 }
 0xa22   :  { %v2191_v22 = vsel %vm2175_vm13, %v4225_v62, 0.0  ;;  %v2190_v54 = vsel %vm2174_vm14, %v4226_v6, 0.0 }
 0xa23   :  { %2207 = vst [vmem:[#allocation5 + $0x58] sm:$0xff] %v2191_v22  ;;  %2206 = vst [vmem:[#allocation5 + $0x50] sm:$0xff] %v2190_v54 }
 0xa24   :  { %v2159_v55 = vpop.xlane.xlu0 %2158  ;;  %v2157_v31 = vpop.xlane.xlu1 %2156 }
 0xa25   :  { %vm2177_vm15 = vcmp.ge.f32.partialorder %v4227_v52, %v2159_v55  ;;  %vm2176_vm1 = vcmp.ge.f32.partialorder %v4228_v26, %v2157_v31 }
 0xa26   :  { %v2193_v19 = vsel %vm2177_vm15, %v4227_v52, 0.0  ;;  %v2192_v18 = vsel %vm2176_vm1, %v4228_v26, 0.0 }
 0xa27   :  { %2209 = vst [vmem:[#allocation5 + $0x68] sm:$0xff] %v2193_v19  ;;  %2208 = vst [vmem:[#allocation5 + $0x60] sm:$0xff] %v2192_v18 }
 0xa28   :  { %v2163_v8 = vpop.xlane.xlu0 %2162  ;;  %v2161_v29 = vpop.xlane.xlu1 %2160 }
 0xa29   :  { %vm2179_vm2 = vcmp.ge.f32.partialorder %v4229_v59, %v2163_v8  ;;  %vm2178_vm0 = vcmp.ge.f32.partialorder %v4230_v47, %v2161_v29 }
 0xa2a   :  { %v2195_v2 = vsel %vm2179_vm2, %v4229_v59, 0.0  ;;  %v2194_v61 = vsel %vm2178_vm0, %v4230_v47, 0.0 }
 0xa2b   :  { %2211 = vst [vmem:[#allocation5 + $0x78] sm:$0xff] %v2195_v2  ;;  %2210 = vst [vmem:[#allocation5 + $0x70] sm:$0xff] %v2194_v61 }
 0xa2c   :  { %2833 = shalt.err (!%p2830_p12)
}
 0xa2d   :  { %s2834_s24 = scalar_lea.hbm %s4184_s5, 2048 }
 0xa2e   :  { %p2835_p13 = scmp.ne.s32.totalorder %s4184_s5, %s2834_s24  ;;  %p2838_p0 = scmp.lt.u32.totalorder %s2834_s24, %s4184_s5 }
 0xa30   :  { %p2840_p1 = pnand %p2838_p0, %p2835_p13 }
 0xa32   :  { %2843 = shalt.err (!%p2840_p1)
}
 0xa33   :  { %2223 = dma.vmem_to_hbm [thread:$0]  %s2218_s4, 2048, %s4184_s5, [#allocation4], %s2849_s28, %s2849_s28, %s2850_s29  }
 0xa34   :  { %2846 = dma.done.wait [#allocation4], 2048  }
 0xa35   :  { %2847 = vsyncadd [#allocation4], 4294965248 }
 0xa36   :  { %2227 = vsyncpa [#allocation3], 1 }
 0xa37   :  { %2228 = vsyncpa [#allocation4], 1 }

</bundles_post_ra>
